<compile_context>
chip_gen: v7x
topology: tpu7x:2x2x1
jax: 0.10.0
libtpu: 0.0.40
codegen_flags: <defaults>
</compile_context>

<pallas_src>
import functools

import jax
import jax.numpy as jnp
from jax.experimental import pallas as pl
from jax.experimental.pallas import tpu as pltpu


# ----------------------------- Pallas kernel ------------------------------ #
def bilstm_attn_kernel(
    emb_ref,      # (T*B, H)   embedded inputs, time-major, flattened
    wih_all_ref,  # (H, 8H)    [W_ih_f^T | W_ih_b^T]
    whh_f_ref,    # (H, 4H)    forward  W_hh^T
    whh_b_ref,    # (H, 4H)    backward W_hh^T
    b_all_ref,    # (1, 8H)    [b_ih_f + b_hh_f | b_ih_b + b_hh_b]
    w_attn_ref,   # (1, 2H)    attention weight (nn.Linear(2H, 1, bias=False))
    fc_w_ref,     # (2H, O)    fc weight^T
    fc_b_ref,     # (1, O)     fc bias
    out_ref,      # (B, O)     output
    *, T, B, H,
):
    G = 4 * H

    # ---- read weights / biases once; they stay resident for the loop ---- #
    whh_f = whh_f_ref[...]
    whh_b = whh_b_ref[...]
    wa = w_attn_ref[...]                                     # (1, 2H)

    # ---- hoisted input-to-hidden projection for BOTH directions --------- #
    # One (T*B, H) @ (H, 8H) MXU matmul (+bias) replaces 2*T tiny per-step
    # x @ W_ih matmuls on the strictly serial critical path.
    xproj = (jnp.dot(emb_ref[...], wih_all_ref[...],
                     preferred_element_type=jnp.float32)
             + b_all_ref[...])                               # (T*B, 8H)

    def cell(gates, c):
        # 2 EUP pushes on the full (B, 4H) tile instead of 4 per-gate pushes.
        sig = jax.nn.sigmoid(gates)
        tnh = jnp.tanh(gates)
        i = sig[:, 0 * H:1 * H]
        f = sig[:, 1 * H:2 * H]
        g = tnh[:, 2 * H:3 * H]
        o = sig[:, 3 * H:4 * H]
        c_new = f * c + i * g
        h_new = o * jnp.tanh(c_new)
        return h_new, c_new

    zeros = jnp.zeros((B, H), jnp.float32)
    h_f, c_f = zeros, zeros
    h_b, c_b = zeros, zeros
    hs_f = [None] * T
    hs_b = [None] * T

    # ---- fully unrolled bidirectional recurrence (T static, small) ------ #
    # Only h @ W_hh remains per step; fwd/bwd chains are independent.
    for t in range(T):
        tb = T - 1 - t
        xf = xproj[t * B:(t + 1) * B, 0:G]          # fwd pre-activation @ t
        xb = xproj[tb * B:(tb + 1) * B, G:2 * G]    # bwd pre-activation @ tb
        gates_f = xf + jnp.dot(h_f, whh_f, preferred_element_type=jnp.float32)
        gates_b = xb + jnp.dot(h_b, whh_b, preferred_element_type=jnp.float32)
        h_f, c_f = cell(gates_f, c_f)
        h_b, c_b = cell(gates_b, c_b)
        hs_f[t] = h_f
        hs_b[tb] = h_b

    # ---- PyTorch-layout per-time hidden tiles: (B, 2H) = [fwd | bwd] ----- #
    lstm_out = [jnp.concatenate([hs_f[t], hs_b[t]], axis=1) for t in range(T)]

    # ---- attention: lane-dense (B, T) scores, softmax over time --------- #
    score_cols = [jnp.sum(lstm_out[t] * wa, axis=1, keepdims=True)
                  for t in range(T)]                         # T x (B, 1)
    scores = jnp.concatenate(score_cols, axis=1)             # (B, T)
    m = jnp.max(scores, axis=1, keepdims=True)
    e = jnp.exp(scores - m)
    attn = e / jnp.sum(e, axis=1, keepdims=True)             # (B, T)

    # ---- context: weighted sum over time, balanced-tree accumulation ---- #
    terms = [attn[:, t:t + 1] * lstm_out[t] for t in range(T)]   # (B, 2H) each
    while len(terms) > 1:
        nxt = [terms[i] + terms[i + 1] for i in range(0, len(terms) - 1, 2)]
        if len(terms) % 2:
            nxt.append(terms[-1])
        terms = nxt
    ctx = terms[0]                                           # (B, 2H)

    # ---- final linear on the concatenated context (single MXU dot) ------ #
    out_ref[...] = (jnp.dot(ctx, fc_w_ref[...],
                            preferred_element_type=jnp.float32)
                    + fc_b_ref[...])


# ------------------------------- wrapper ----------------------------------- #
def bilstm_with_attention(x_tokens, params):
    """x_tokens: (B, T) int32 token ids.  Returns (B, O) float32."""
    emb_table = params["emb_table"]                          # (V, H)
    B, T = x_tokens.shape
    H = emb_table.shape[1]
    O = params["fc_w"].shape[1]

    # glue: embedding gather + time-major flatten to (T*B, H)
    embedded = jnp.take(emb_table, x_tokens, axis=0)         # (B, T, H)
    emb2d = jnp.transpose(embedded, (1, 0, 2)).reshape(T * B, H)

    # pack both directions' input weights / biases for the hoisted projection
    wih_all = jnp.concatenate([params["wih_f"], params["wih_b"]], axis=1)  # (H, 8H)
    b_all = jnp.concatenate([params["b_f"], params["b_b"]], axis=1)        # (1, 8H)

    vmem = pl.BlockSpec(memory_space=pltpu.MemorySpace.VMEM)
    kernel = functools.partial(bilstm_attn_kernel, T=T, B=B, H=H)

    return pl.pallas_call(
        kernel,
        out_shape=jax.ShapeDtypeStruct((B, O), jnp.float32),
        in_specs=[vmem] * 8,
        out_specs=vmem,
    )(
        emb2d, wih_all,
        params["whh_f"], params["whh_b"], b_all,
        params["w_attn"], params["fc_w"], params["fc_b"],
    )


# --------------------------- pure-JAX reference ---------------------------- #
def reference_forward(x_tokens, params):
    emb = jnp.take(params["emb_table"], x_tokens, axis=0)    # (B, T, H)
    B, T, H = emb.shape
    emb_t = jnp.transpose(emb, (1, 0, 2))                    # (T, B, H)

    def run_dir(seq, wih, whh, b):
        def step(carry, xt):
            h, c = carry
            gates = xt @ wih + h @ whh + b
            i, f, g, o = jnp.split(gates, 4, axis=-1)
            i = jax.nn.sigmoid(i)
            f = jax.nn.sigmoid(f)
            g = jnp.tanh(g)
            o = jax.nn.sigmoid(o)
            c = f * c + i * g
            h = o * jnp.tanh(c)
            return (h, c), h
        h0 = jnp.zeros((B, H), jnp.float32)
        c0 = jnp.zeros((B, H), jnp.float32)
        _, hs = jax.lax.scan(step, (h0, c0), seq)
        return hs                                            # (T, B, H)

    hs_f = run_dir(emb_t, params["wih_f"], params["whh_f"], params["b_f"])
    hs_b = run_dir(emb_t[::-1], params["wih_b"], params["whh_b"], params["b_b"])[::-1]
    lstm_out = jnp.concatenate([hs_f, hs_b], axis=-1)        # (T, B, 2H)

    scores = jnp.einsum("tbh,h->tb", lstm_out, params["w_attn"][0])
    attn = jax.nn.softmax(scores, axis=0)                    # softmax over time
    ctx = jnp.einsum("tb,tbh->bh", attn, lstm_out)           # (B, 2H)
    return ctx @ params["fc_w"] + params["fc_b"]


# ------------------------------- main -------------------------------------- #
def make_params(key, vocab, hidden, out_dim):
    H, O = hidden, out_dim
    ks = jax.random.split(key, 12)
    k_lstm = 1.0 / jnp.sqrt(H)
    k_lin = 1.0 / jnp.sqrt(2.0 * H)

    def unif(k, shape, scale):
        return jax.random.uniform(k, shape, jnp.float32, -scale, scale)

    params = {
        "emb_table": jax.random.normal(ks[0], (vocab, H), jnp.float32),
        # forward direction (PyTorch gate order i,f,g,o; weights transposed)
        "wih_f": unif(ks[1], (H, 4 * H), k_lstm),
        "whh_f": unif(ks[2], (H, 4 * H), k_lstm),
        "b_f": (unif(ks[3], (1, 4 * H), k_lstm) + unif(ks[4], (1, 4 * H), k_lstm)),
        # backward direction
        "wih_b": unif(ks[5], (H, 4 * H), k_lstm),
        "whh_b": unif(ks[6], (H, 4 * H), k_lstm),
        "b_b": (unif(ks[7], (1, 4 * H), k_lstm) + unif(ks[8], (1, 4 * H), k_lstm)),
        # attention: nn.Linear(2H, 1, bias=False)
        "w_attn": unif(ks[9], (1, 2 * H), k_lin),
        # fc: nn.Linear(2H, O)
        "fc_w": unif(ks[10], (2 * H, O), k_lin),
        "fc_b": unif(ks[11], (1, O), k_lin),
    }
    return params


if __name__ == "__main__":
    VOCAB, HIDDEN, OUT = 16, 32, 4
    B, T = 2, 8

    key = jax.random.PRNGKey(0)
    k_par, k_tok = jax.random.split(key)
    params = make_params(k_par, VOCAB, HIDDEN, OUT)
    x = jax.random.randint(k_tok, (B, T), 0, VOCAB, dtype=jnp.int32)

    out = bilstm_with_attention(x, params)
    out = jax.block_until_ready(out)

    ref = jax.block_until_ready(reference_forward(x, params))
    assert out.shape == (B, OUT)
    assert bool(jnp.allclose(out, ref, atol=1e-4, rtol=1e-4)), "mismatch vs reference"

    print("KERNEL_OK")
</pallas_src>

<mosaic_0001>
module attributes {stable_mosaic.version = 11 : i64} {
  func.func @bilstm_attn_kernel(%arg0: memref<16x32xf32, #tpu.memory_space<vmem>>, %arg1: memref<32x256xf32, #tpu.memory_space<vmem>>, %arg2: memref<32x128xf32, #tpu.memory_space<vmem>>, %arg3: memref<32x128xf32, #tpu.memory_space<vmem>>, %arg4: memref<1x256xf32, #tpu.memory_space<vmem>>, %arg5: memref<1x64xf32, #tpu.memory_space<vmem>>, %arg6: memref<64x4xf32, #tpu.memory_space<vmem>>, %arg7: memref<1x4xf32, #tpu.memory_space<vmem>>, %arg8: memref<2x4xf32, #tpu.memory_space<vmem>>) attributes {dimension_semantics = [], scalar_prefetch = 0 : i64, scratch_operands = 0 : i64, tpu.core_type = #tpu.core_type<tc>} {
    %c0 = arith.constant 0 : index
    %c0_0 = arith.constant 0 : index
    %0 = vector.load %arg2[%c0, %c0_0] : memref<32x128xf32, #tpu.memory_space<vmem>>, vector<32x128xf32>
    %c0_1 = arith.constant 0 : index
    %c0_2 = arith.constant 0 : index
    %1 = vector.load %arg3[%c0_1, %c0_2] : memref<32x128xf32, #tpu.memory_space<vmem>>, vector<32x128xf32>
    %c0_3 = arith.constant 0 : index
    %c0_4 = arith.constant 0 : index
    %2 = vector.load %arg5[%c0_3, %c0_4] : memref<1x64xf32, #tpu.memory_space<vmem>>, vector<1x64xf32>
    %c0_5 = arith.constant 0 : index
    %c0_6 = arith.constant 0 : index
    %3 = vector.load %arg0[%c0_5, %c0_6] : memref<16x32xf32, #tpu.memory_space<vmem>>, vector<16x32xf32>
    %c0_7 = arith.constant 0 : index
    %c0_8 = arith.constant 0 : index
    %4 = vector.load %arg1[%c0_7, %c0_8] : memref<32x256xf32, #tpu.memory_space<vmem>>, vector<32x256xf32>
    %cst = arith.constant dense<0.000000e+00> : vector<16x256xf32>
    %5 = tpu.matmul %3, %4, %cst {dimension_numbers = #tpu.dot_dimension_numbers<[1], [0], [0], [1], [0, 0, 1, 1], [], []>} : vector<16x32xf32>, vector<32x256xf32>, vector<16x256xf32> -> vector<16x256xf32>
    %c0_9 = arith.constant 0 : index
    %c0_10 = arith.constant 0 : index
    %6 = vector.load %arg4[%c0_9, %c0_10] : memref<1x256xf32, #tpu.memory_space<vmem>>, vector<1x256xf32>
    %7 = vector.broadcast %6 : vector<1x256xf32> to vector<16x256xf32>
    %8 = arith.addf %5, %7 : vector<16x256xf32>
    %cst_11 = arith.constant 0.000000e+00 : f32
    %9 = vector.broadcast %cst_11 : f32 to vector<2x32xf32>
    %10 = vector.extract_strided_slice %8 {offsets = [0, 0], sizes = [2, 128], strides = [1, 1]} : vector<16x256xf32> to vector<2x128xf32>
    %11 = vector.extract_strided_slice %8 {offsets = [14, 128], sizes = [2, 128], strides = [1, 1]} : vector<16x256xf32> to vector<2x128xf32>
    %cst_12 = arith.constant dense<0.000000e+00> : vector<2x128xf32>
    %12 = tpu.matmul %9, %0, %cst_12 {dimension_numbers = #tpu.dot_dimension_numbers<[1], [0], [0], [1], [0, 0, 1, 1], [], []>} : vector<2x32xf32>, vector<32x128xf32>, vector<2x128xf32> -> vector<2x128xf32>
    %13 = arith.addf %10, %12 : vector<2x128xf32>
    %cst_13 = arith.constant dense<0.000000e+00> : vector<2x128xf32>
    %14 = tpu.matmul %9, %1, %cst_13 {dimension_numbers = #tpu.dot_dimension_numbers<[1], [0], [0], [1], [0, 0, 1, 1], [], []>} : vector<2x32xf32>, vector<32x128xf32>, vector<2x128xf32> -> vector<2x128xf32>
    %15 = arith.addf %11, %14 : vector<2x128xf32>
    %16 = arith.negf %13 : vector<2x128xf32>
    %17 = math.exp %16 : vector<2x128xf32>
    %cst_14 = arith.constant 1.000000e+00 : f32
    %18 = vector.broadcast %cst_14 : f32 to vector<2x128xf32>
    %19 = arith.addf %18, %17 : vector<2x128xf32>
    %20 = arith.divf %18, %19 : vector<2x128xf32>
    %21 = math.tanh %13 : vector<2x128xf32>
    %22 = vector.extract_strided_slice %20 {offsets = [0, 0], sizes = [2, 32], strides = [1, 1]} : vector<2x128xf32> to vector<2x32xf32>
    %23 = vector.extract_strided_slice %20 {offsets = [0, 32], sizes = [2, 32], strides = [1, 1]} : vector<2x128xf32> to vector<2x32xf32>
    %24 = vector.extract_strided_slice %21 {offsets = [0, 64], sizes = [2, 32], strides = [1, 1]} : vector<2x128xf32> to vector<2x32xf32>
    %25 = vector.extract_strided_slice %20 {offsets = [0, 96], sizes = [2, 32], strides = [1, 1]} : vector<2x128xf32> to vector<2x32xf32>
    %26 = arith.mulf %23, %9 : vector<2x32xf32>
    %27 = arith.mulf %22, %24 : vector<2x32xf32>
    %28 = arith.addf %26, %27 : vector<2x32xf32>
    %29 = math.tanh %28 : vector<2x32xf32>
    %30 = arith.mulf %25, %29 : vector<2x32xf32>
    %31 = arith.negf %15 : vector<2x128xf32>
    %32 = math.exp %31 : vector<2x128xf32>
    %cst_15 = arith.constant 1.000000e+00 : f32
    %33 = vector.broadcast %cst_15 : f32 to vector<2x128xf32>
    %34 = arith.addf %33, %32 : vector<2x128xf32>
    %35 = arith.divf %33, %34 : vector<2x128xf32>
    %36 = math.tanh %15 : vector<2x128xf32>
    %37 = vector.extract_strided_slice %35 {offsets = [0, 0], sizes = [2, 32], strides = [1, 1]} : vector<2x128xf32> to vector<2x32xf32>
    %38 = vector.extract_strided_slice %35 {offsets = [0, 32], sizes = [2, 32], strides = [1, 1]} : vector<2x128xf32> to vector<2x32xf32>
    %39 = vector.extract_strided_slice %36 {offsets = [0, 64], sizes = [2, 32], strides = [1, 1]} : vector<2x128xf32> to vector<2x32xf32>
    %40 = vector.extract_strided_slice %35 {offsets = [0, 96], sizes = [2, 32], strides = [1, 1]} : vector<2x128xf32> to vector<2x32xf32>
    %41 = arith.mulf %38, %9 : vector<2x32xf32>
    %42 = arith.mulf %37, %39 : vector<2x32xf32>
    %43 = arith.addf %41, %42 : vector<2x32xf32>
    %44 = math.tanh %43 : vector<2x32xf32>
    %45 = arith.mulf %40, %44 : vector<2x32xf32>
    %46 = vector.extract_strided_slice %8 {offsets = [2, 0], sizes = [2, 128], strides = [1, 1]} : vector<16x256xf32> to vector<2x128xf32>
    %47 = vector.extract_strided_slice %8 {offsets = [12, 128], sizes = [2, 128], strides = [1, 1]} : vector<16x256xf32> to vector<2x128xf32>
    %cst_16 = arith.constant dense<0.000000e+00> : vector<2x128xf32>
    %48 = tpu.matmul %30, %0, %cst_16 {dimension_numbers = #tpu.dot_dimension_numbers<[1], [0], [0], [1], [0, 0, 1, 1], [], []>} : vector<2x32xf32>, vector<32x128xf32>, vector<2x128xf32> -> vector<2x128xf32>
    %49 = arith.addf %46, %48 : vector<2x128xf32>
    %cst_17 = arith.constant dense<0.000000e+00> : vector<2x128xf32>
    %50 = tpu.matmul %45, %1, %cst_17 {dimension_numbers = #tpu.dot_dimension_numbers<[1], [0], [0], [1], [0, 0, 1, 1], [], []>} : vector<2x32xf32>, vector<32x128xf32>, vector<2x128xf32> -> vector<2x128xf32>
    %51 = arith.addf %47, %50 : vector<2x128xf32>
    %52 = arith.negf %49 : vector<2x128xf32>
    %53 = math.exp %52 : vector<2x128xf32>
    %cst_18 = arith.constant 1.000000e+00 : f32
    %54 = vector.broadcast %cst_18 : f32 to vector<2x128xf32>
    %55 = arith.addf %54, %53 : vector<2x128xf32>
    %56 = arith.divf %54, %55 : vector<2x128xf32>
    %57 = math.tanh %49 : vector<2x128xf32>
    %58 = vector.extract_strided_slice %56 {offsets = [0, 0], sizes = [2, 32], strides = [1, 1]} : vector<2x128xf32> to vector<2x32xf32>
    %59 = vector.extract_strided_slice %56 {offsets = [0, 32], sizes = [2, 32], strides = [1, 1]} : vector<2x128xf32> to vector<2x32xf32>
    %60 = vector.extract_strided_slice %57 {offsets = [0, 64], sizes = [2, 32], strides = [1, 1]} : vector<2x128xf32> to vector<2x32xf32>
    %61 = vector.extract_strided_slice %56 {offsets = [0, 96], sizes = [2, 32], strides = [1, 1]} : vector<2x128xf32> to vector<2x32xf32>
    %62 = arith.mulf %59, %28 : vector<2x32xf32>
    %63 = arith.mulf %58, %60 : vector<2x32xf32>
    %64 = arith.addf %62, %63 : vector<2x32xf32>
    %65 = math.tanh %64 : vector<2x32xf32>
    %66 = arith.mulf %61, %65 : vector<2x32xf32>
    %67 = arith.negf %51 : vector<2x128xf32>
    %68 = math.exp %67 : vector<2x128xf32>
    %cst_19 = arith.constant 1.000000e+00 : f32
    %69 = vector.broadcast %cst_19 : f32 to vector<2x128xf32>
    %70 = arith.addf %69, %68 : vector<2x128xf32>
    %71 = arith.divf %69, %70 : vector<2x128xf32>
    %72 = math.tanh %51 : vector<2x128xf32>
    %73 = vector.extract_strided_slice %71 {offsets = [0, 0], sizes = [2, 32], strides = [1, 1]} : vector<2x128xf32> to vector<2x32xf32>
    %74 = vector.extract_strided_slice %71 {offsets = [0, 32], sizes = [2, 32], strides = [1, 1]} : vector<2x128xf32> to vector<2x32xf32>
    %75 = vector.extract_strided_slice %72 {offsets = [0, 64], sizes = [2, 32], strides = [1, 1]} : vector<2x128xf32> to vector<2x32xf32>
    %76 = vector.extract_strided_slice %71 {offsets = [0, 96], sizes = [2, 32], strides = [1, 1]} : vector<2x128xf32> to vector<2x32xf32>
    %77 = arith.mulf %74, %43 : vector<2x32xf32>
    %78 = arith.mulf %73, %75 : vector<2x32xf32>
    %79 = arith.addf %77, %78 : vector<2x32xf32>
    %80 = math.tanh %79 : vector<2x32xf32>
    %81 = arith.mulf %76, %80 : vector<2x32xf32>
    %82 = vector.extract_strided_slice %8 {offsets = [4, 0], sizes = [2, 128], strides = [1, 1]} : vector<16x256xf32> to vector<2x128xf32>
    %83 = vector.extract_strided_slice %8 {offsets = [10, 128], sizes = [2, 128], strides = [1, 1]} : vector<16x256xf32> to vector<2x128xf32>
    %cst_20 = arith.constant dense<0.000000e+00> : vector<2x128xf32>
    %84 = tpu.matmul %66, %0, %cst_20 {dimension_numbers = #tpu.dot_dimension_numbers<[1], [0], [0], [1], [0, 0, 1, 1], [], []>} : vector<2x32xf32>, vector<32x128xf32>, vector<2x128xf32> -> vector<2x128xf32>
    %85 = arith.addf %82, %84 : vector<2x128xf32>
    %cst_21 = arith.constant dense<0.000000e+00> : vector<2x128xf32>
    %86 = tpu.matmul %81, %1, %cst_21 {dimension_numbers = #tpu.dot_dimension_numbers<[1], [0], [0], [1], [0, 0, 1, 1], [], []>} : vector<2x32xf32>, vector<32x128xf32>, vector<2x128xf32> -> vector<2x128xf32>
    %87 = arith.addf %83, %86 : vector<2x128xf32>
    %88 = arith.negf %85 : vector<2x128xf32>
    %89 = math.exp %88 : vector<2x128xf32>
    %cst_22 = arith.constant 1.000000e+00 : f32
    %90 = vector.broadcast %cst_22 : f32 to vector<2x128xf32>
    %91 = arith.addf %90, %89 : vector<2x128xf32>
    %92 = arith.divf %90, %91 : vector<2x128xf32>
    %93 = math.tanh %85 : vector<2x128xf32>
    %94 = vector.extract_strided_slice %92 {offsets = [0, 0], sizes = [2, 32], strides = [1, 1]} : vector<2x128xf32> to vector<2x32xf32>
    %95 = vector.extract_strided_slice %92 {offsets = [0, 32], sizes = [2, 32], strides = [1, 1]} : vector<2x128xf32> to vector<2x32xf32>
    %96 = vector.extract_strided_slice %93 {offsets = [0, 64], sizes = [2, 32], strides = [1, 1]} : vector<2x128xf32> to vector<2x32xf32>
    %97 = vector.extract_strided_slice %92 {offsets = [0, 96], sizes = [2, 32], strides = [1, 1]} : vector<2x128xf32> to vector<2x32xf32>
    %98 = arith.mulf %95, %64 : vector<2x32xf32>
    %99 = arith.mulf %94, %96 : vector<2x32xf32>
    %100 = arith.addf %98, %99 : vector<2x32xf32>
    %101 = math.tanh %100 : vector<2x32xf32>
    %102 = arith.mulf %97, %101 : vector<2x32xf32>
    %103 = arith.negf %87 : vector<2x128xf32>
    %104 = math.exp %103 : vector<2x128xf32>
    %cst_23 = arith.constant 1.000000e+00 : f32
    %105 = vector.broadcast %cst_23 : f32 to vector<2x128xf32>
    %106 = arith.addf %105, %104 : vector<2x128xf32>
    %107 = arith.divf %105, %106 : vector<2x128xf32>
    %108 = math.tanh %87 : vector<2x128xf32>
    %109 = vector.extract_strided_slice %107 {offsets = [0, 0], sizes = [2, 32], strides = [1, 1]} : vector<2x128xf32> to vector<2x32xf32>
    %110 = vector.extract_strided_slice %107 {offsets = [0, 32], sizes = [2, 32], strides = [1, 1]} : vector<2x128xf32> to vector<2x32xf32>
    %111 = vector.extract_strided_slice %108 {offsets = [0, 64], sizes = [2, 32], strides = [1, 1]} : vector<2x128xf32> to vector<2x32xf32>
    %112 = vector.extract_strided_slice %107 {offsets = [0, 96], sizes = [2, 32], strides = [1, 1]} : vector<2x128xf32> to vector<2x32xf32>
    %113 = arith.mulf %110, %79 : vector<2x32xf32>
    %114 = arith.mulf %109, %111 : vector<2x32xf32>
    %115 = arith.addf %113, %114 : vector<2x32xf32>
    %116 = math.tanh %115 : vector<2x32xf32>
    %117 = arith.mulf %112, %116 : vector<2x32xf32>
    %118 = vector.extract_strided_slice %8 {offsets = [6, 0], sizes = [2, 128], strides = [1, 1]} : vector<16x256xf32> to vector<2x128xf32>
    %119 = vector.extract_strided_slice %8 {offsets = [8, 128], sizes = [2, 128], strides = [1, 1]} : vector<16x256xf32> to vector<2x128xf32>
    %cst_24 = arith.constant dense<0.000000e+00> : vector<2x128xf32>
    %120 = tpu.matmul %102, %0, %cst_24 {dimension_numbers = #tpu.dot_dimension_numbers<[1], [0], [0], [1], [0, 0, 1, 1], [], []>} : vector<2x32xf32>, vector<32x128xf32>, vector<2x128xf32> -> vector<2x128xf32>
    %121 = arith.addf %118, %120 : vector<2x128xf32>
    %cst_25 = arith.constant dense<0.000000e+00> : vector<2x128xf32>
    %122 = tpu.matmul %117, %1, %cst_25 {dimension_numbers = #tpu.dot_dimension_numbers<[1], [0], [0], [1], [0, 0, 1, 1], [], []>} : vector<2x32xf32>, vector<32x128xf32>, vector<2x128xf32> -> vector<2x128xf32>
    %123 = arith.addf %119, %122 : vector<2x128xf32>
    %124 = arith.negf %121 : vector<2x128xf32>
    %125 = math.exp %124 : vector<2x128xf32>
    %cst_26 = arith.constant 1.000000e+00 : f32
    %126 = vector.broadcast %cst_26 : f32 to vector<2x128xf32>
    %127 = arith.addf %126, %125 : vector<2x128xf32>
    %128 = arith.divf %126, %127 : vector<2x128xf32>
    %129 = math.tanh %121 : vector<2x128xf32>
    %130 = vector.extract_strided_slice %128 {offsets = [0, 0], sizes = [2, 32], strides = [1, 1]} : vector<2x128xf32> to vector<2x32xf32>
    %131 = vector.extract_strided_slice %128 {offsets = [0, 32], sizes = [2, 32], strides = [1, 1]} : vector<2x128xf32> to vector<2x32xf32>
    %132 = vector.extract_strided_slice %129 {offsets = [0, 64], sizes = [2, 32], strides = [1, 1]} : vector<2x128xf32> to vector<2x32xf32>
    %133 = vector.extract_strided_slice %128 {offsets = [0, 96], sizes = [2, 32], strides = [1, 1]} : vector<2x128xf32> to vector<2x32xf32>
    %134 = arith.mulf %131, %100 : vector<2x32xf32>
    %135 = arith.mulf %130, %132 : vector<2x32xf32>
    %136 = arith.addf %134, %135 : vector<2x32xf32>
    %137 = math.tanh %136 : vector<2x32xf32>
    %138 = arith.mulf %133, %137 : vector<2x32xf32>
    %139 = arith.negf %123 : vector<2x128xf32>
    %140 = math.exp %139 : vector<2x128xf32>
    %cst_27 = arith.constant 1.000000e+00 : f32
    %141 = vector.broadcast %cst_27 : f32 to vector<2x128xf32>
    %142 = arith.addf %141, %140 : vector<2x128xf32>
    %143 = arith.divf %141, %142 : vector<2x128xf32>
    %144 = math.tanh %123 : vector<2x128xf32>
    %145 = vector.extract_strided_slice %143 {offsets = [0, 0], sizes = [2, 32], strides = [1, 1]} : vector<2x128xf32> to vector<2x32xf32>
    %146 = vector.extract_strided_slice %143 {offsets = [0, 32], sizes = [2, 32], strides = [1, 1]} : vector<2x128xf32> to vector<2x32xf32>
    %147 = vector.extract_strided_slice %144 {offsets = [0, 64], sizes = [2, 32], strides = [1, 1]} : vector<2x128xf32> to vector<2x32xf32>
    %148 = vector.extract_strided_slice %143 {offsets = [0, 96], sizes = [2, 32], strides = [1, 1]} : vector<2x128xf32> to vector<2x32xf32>
    %149 = arith.mulf %146, %115 : vector<2x32xf32>
    %150 = arith.mulf %145, %147 : vector<2x32xf32>
    %151 = arith.addf %149, %150 : vector<2x32xf32>
    %152 = math.tanh %151 : vector<2x32xf32>
    %153 = arith.mulf %148, %152 : vector<2x32xf32>
    %154 = vector.extract_strided_slice %8 {offsets = [8, 0], sizes = [2, 128], strides = [1, 1]} : vector<16x256xf32> to vector<2x128xf32>
    %155 = vector.extract_strided_slice %8 {offsets = [6, 128], sizes = [2, 128], strides = [1, 1]} : vector<16x256xf32> to vector<2x128xf32>
    %cst_28 = arith.constant dense<0.000000e+00> : vector<2x128xf32>
    %156 = tpu.matmul %138, %0, %cst_28 {dimension_numbers = #tpu.dot_dimension_numbers<[1], [0], [0], [1], [0, 0, 1, 1], [], []>} : vector<2x32xf32>, vector<32x128xf32>, vector<2x128xf32> -> vector<2x128xf32>
    %157 = arith.addf %154, %156 : vector<2x128xf32>
    %cst_29 = arith.constant dense<0.000000e+00> : vector<2x128xf32>
    %158 = tpu.matmul %153, %1, %cst_29 {dimension_numbers = #tpu.dot_dimension_numbers<[1], [0], [0], [1], [0, 0, 1, 1], [], []>} : vector<2x32xf32>, vector<32x128xf32>, vector<2x128xf32> -> vector<2x128xf32>
    %159 = arith.addf %155, %158 : vector<2x128xf32>
    %160 = arith.negf %157 : vector<2x128xf32>
    %161 = math.exp %160 : vector<2x128xf32>
    %cst_30 = arith.constant 1.000000e+00 : f32
    %162 = vector.broadcast %cst_30 : f32 to vector<2x128xf32>
    %163 = arith.addf %162, %161 : vector<2x128xf32>
    %164 = arith.divf %162, %163 : vector<2x128xf32>
    %165 = math.tanh %157 : vector<2x128xf32>
    %166 = vector.extract_strided_slice %164 {offsets = [0, 0], sizes = [2, 32], strides = [1, 1]} : vector<2x128xf32> to vector<2x32xf32>
    %167 = vector.extract_strided_slice %164 {offsets = [0, 32], sizes = [2, 32], strides = [1, 1]} : vector<2x128xf32> to vector<2x32xf32>
    %168 = vector.extract_strided_slice %165 {offsets = [0, 64], sizes = [2, 32], strides = [1, 1]} : vector<2x128xf32> to vector<2x32xf32>
    %169 = vector.extract_strided_slice %164 {offsets = [0, 96], sizes = [2, 32], strides = [1, 1]} : vector<2x128xf32> to vector<2x32xf32>
    %170 = arith.mulf %167, %136 : vector<2x32xf32>
    %171 = arith.mulf %166, %168 : vector<2x32xf32>
    %172 = arith.addf %170, %171 : vector<2x32xf32>
    %173 = math.tanh %172 : vector<2x32xf32>
    %174 = arith.mulf %169, %173 : vector<2x32xf32>
    %175 = arith.negf %159 : vector<2x128xf32>
    %176 = math.exp %175 : vector<2x128xf32>
    %cst_31 = arith.constant 1.000000e+00 : f32
    %177 = vector.broadcast %cst_31 : f32 to vector<2x128xf32>
    %178 = arith.addf %177, %176 : vector<2x128xf32>
    %179 = arith.divf %177, %178 : vector<2x128xf32>
    %180 = math.tanh %159 : vector<2x128xf32>
    %181 = vector.extract_strided_slice %179 {offsets = [0, 0], sizes = [2, 32], strides = [1, 1]} : vector<2x128xf32> to vector<2x32xf32>
    %182 = vector.extract_strided_slice %179 {offsets = [0, 32], sizes = [2, 32], strides = [1, 1]} : vector<2x128xf32> to vector<2x32xf32>
    %183 = vector.extract_strided_slice %180 {offsets = [0, 64], sizes = [2, 32], strides = [1, 1]} : vector<2x128xf32> to vector<2x32xf32>
    %184 = vector.extract_strided_slice %179 {offsets = [0, 96], sizes = [2, 32], strides = [1, 1]} : vector<2x128xf32> to vector<2x32xf32>
    %185 = arith.mulf %182, %151 : vector<2x32xf32>
    %186 = arith.mulf %181, %183 : vector<2x32xf32>
    %187 = arith.addf %185, %186 : vector<2x32xf32>
    %188 = math.tanh %187 : vector<2x32xf32>
    %189 = arith.mulf %184, %188 : vector<2x32xf32>
    %190 = vector.extract_strided_slice %8 {offsets = [10, 0], sizes = [2, 128], strides = [1, 1]} : vector<16x256xf32> to vector<2x128xf32>
    %191 = vector.extract_strided_slice %8 {offsets = [4, 128], sizes = [2, 128], strides = [1, 1]} : vector<16x256xf32> to vector<2x128xf32>
    %cst_32 = arith.constant dense<0.000000e+00> : vector<2x128xf32>
    %192 = tpu.matmul %174, %0, %cst_32 {dimension_numbers = #tpu.dot_dimension_numbers<[1], [0], [0], [1], [0, 0, 1, 1], [], []>} : vector<2x32xf32>, vector<32x128xf32>, vector<2x128xf32> -> vector<2x128xf32>
    %193 = arith.addf %190, %192 : vector<2x128xf32>
    %cst_33 = arith.constant dense<0.000000e+00> : vector<2x128xf32>
    %194 = tpu.matmul %189, %1, %cst_33 {dimension_numbers = #tpu.dot_dimension_numbers<[1], [0], [0], [1], [0, 0, 1, 1], [], []>} : vector<2x32xf32>, vector<32x128xf32>, vector<2x128xf32> -> vector<2x128xf32>
    %195 = arith.addf %191, %194 : vector<2x128xf32>
    %196 = arith.negf %193 : vector<2x128xf32>
    %197 = math.exp %196 : vector<2x128xf32>
    %cst_34 = arith.constant 1.000000e+00 : f32
    %198 = vector.broadcast %cst_34 : f32 to vector<2x128xf32>
    %199 = arith.addf %198, %197 : vector<2x128xf32>
    %200 = arith.divf %198, %199 : vector<2x128xf32>
    %201 = math.tanh %193 : vector<2x128xf32>
    %202 = vector.extract_strided_slice %200 {offsets = [0, 0], sizes = [2, 32], strides = [1, 1]} : vector<2x128xf32> to vector<2x32xf32>
    %203 = vector.extract_strided_slice %200 {offsets = [0, 32], sizes = [2, 32], strides = [1, 1]} : vector<2x128xf32> to vector<2x32xf32>
    %204 = vector.extract_strided_slice %201 {offsets = [0, 64], sizes = [2, 32], strides = [1, 1]} : vector<2x128xf32> to vector<2x32xf32>
    %205 = vector.extract_strided_slice %200 {offsets = [0, 96], sizes = [2, 32], strides = [1, 1]} : vector<2x128xf32> to vector<2x32xf32>
    %206 = arith.mulf %203, %172 : vector<2x32xf32>
    %207 = arith.mulf %202, %204 : vector<2x32xf32>
    %208 = arith.addf %206, %207 : vector<2x32xf32>
    %209 = math.tanh %208 : vector<2x32xf32>
    %210 = arith.mulf %205, %209 : vector<2x32xf32>
    %211 = arith.negf %195 : vector<2x128xf32>
    %212 = math.exp %211 : vector<2x128xf32>
    %cst_35 = arith.constant 1.000000e+00 : f32
    %213 = vector.broadcast %cst_35 : f32 to vector<2x128xf32>
    %214 = arith.addf %213, %212 : vector<2x128xf32>
    %215 = arith.divf %213, %214 : vector<2x128xf32>
    %216 = math.tanh %195 : vector<2x128xf32>
    %217 = vector.extract_strided_slice %215 {offsets = [0, 0], sizes = [2, 32], strides = [1, 1]} : vector<2x128xf32> to vector<2x32xf32>
    %218 = vector.extract_strided_slice %215 {offsets = [0, 32], sizes = [2, 32], strides = [1, 1]} : vector<2x128xf32> to vector<2x32xf32>
    %219 = vector.extract_strided_slice %216 {offsets = [0, 64], sizes = [2, 32], strides = [1, 1]} : vector<2x128xf32> to vector<2x32xf32>
    %220 = vector.extract_strided_slice %215 {offsets = [0, 96], sizes = [2, 32], strides = [1, 1]} : vector<2x128xf32> to vector<2x32xf32>
    %221 = arith.mulf %218, %187 : vector<2x32xf32>
    %222 = arith.mulf %217, %219 : vector<2x32xf32>
    %223 = arith.addf %221, %222 : vector<2x32xf32>
    %224 = math.tanh %223 : vector<2x32xf32>
    %225 = arith.mulf %220, %224 : vector<2x32xf32>
    %226 = vector.extract_strided_slice %8 {offsets = [12, 0], sizes = [2, 128], strides = [1, 1]} : vector<16x256xf32> to vector<2x128xf32>
    %227 = vector.extract_strided_slice %8 {offsets = [2, 128], sizes = [2, 128], strides = [1, 1]} : vector<16x256xf32> to vector<2x128xf32>
    %cst_36 = arith.constant dense<0.000000e+00> : vector<2x128xf32>
    %228 = tpu.matmul %210, %0, %cst_36 {dimension_numbers = #tpu.dot_dimension_numbers<[1], [0], [0], [1], [0, 0, 1, 1], [], []>} : vector<2x32xf32>, vector<32x128xf32>, vector<2x128xf32> -> vector<2x128xf32>
    %229 = arith.addf %226, %228 : vector<2x128xf32>
    %cst_37 = arith.constant dense<0.000000e+00> : vector<2x128xf32>
    %230 = tpu.matmul %225, %1, %cst_37 {dimension_numbers = #tpu.dot_dimension_numbers<[1], [0], [0], [1], [0, 0, 1, 1], [], []>} : vector<2x32xf32>, vector<32x128xf32>, vector<2x128xf32> -> vector<2x128xf32>
    %231 = arith.addf %227, %230 : vector<2x128xf32>
    %232 = arith.negf %229 : vector<2x128xf32>
    %233 = math.exp %232 : vector<2x128xf32>
    %cst_38 = arith.constant 1.000000e+00 : f32
    %234 = vector.broadcast %cst_38 : f32 to vector<2x128xf32>
    %235 = arith.addf %234, %233 : vector<2x128xf32>
    %236 = arith.divf %234, %235 : vector<2x128xf32>
    %237 = math.tanh %229 : vector<2x128xf32>
    %238 = vector.extract_strided_slice %236 {offsets = [0, 0], sizes = [2, 32], strides = [1, 1]} : vector<2x128xf32> to vector<2x32xf32>
    %239 = vector.extract_strided_slice %236 {offsets = [0, 32], sizes = [2, 32], strides = [1, 1]} : vector<2x128xf32> to vector<2x32xf32>
    %240 = vector.extract_strided_slice %237 {offsets = [0, 64], sizes = [2, 32], strides = [1, 1]} : vector<2x128xf32> to vector<2x32xf32>
    %241 = vector.extract_strided_slice %236 {offsets = [0, 96], sizes = [2, 32], strides = [1, 1]} : vector<2x128xf32> to vector<2x32xf32>
    %242 = arith.mulf %239, %208 : vector<2x32xf32>
    %243 = arith.mulf %238, %240 : vector<2x32xf32>
    %244 = arith.addf %242, %243 : vector<2x32xf32>
    %245 = math.tanh %244 : vector<2x32xf32>
    %246 = arith.mulf %241, %245 : vector<2x32xf32>
    %247 = arith.negf %231 : vector<2x128xf32>
    %248 = math.exp %247 : vector<2x128xf32>
    %cst_39 = arith.constant 1.000000e+00 : f32
    %249 = vector.broadcast %cst_39 : f32 to vector<2x128xf32>
    %250 = arith.addf %249, %248 : vector<2x128xf32>
    %251 = arith.divf %249, %250 : vector<2x128xf32>
    %252 = math.tanh %231 : vector<2x128xf32>
    %253 = vector.extract_strided_slice %251 {offsets = [0, 0], sizes = [2, 32], strides = [1, 1]} : vector<2x128xf32> to vector<2x32xf32>
    %254 = vector.extract_strided_slice %251 {offsets = [0, 32], sizes = [2, 32], strides = [1, 1]} : vector<2x128xf32> to vector<2x32xf32>
    %255 = vector.extract_strided_slice %252 {offsets = [0, 64], sizes = [2, 32], strides = [1, 1]} : vector<2x128xf32> to vector<2x32xf32>
    %256 = vector.extract_strided_slice %251 {offsets = [0, 96], sizes = [2, 32], strides = [1, 1]} : vector<2x128xf32> to vector<2x32xf32>
    %257 = arith.mulf %254, %223 : vector<2x32xf32>
    %258 = arith.mulf %253, %255 : vector<2x32xf32>
    %259 = arith.addf %257, %258 : vector<2x32xf32>
    %260 = math.tanh %259 : vector<2x32xf32>
    %261 = arith.mulf %256, %260 : vector<2x32xf32>
    %262 = vector.extract_strided_slice %8 {offsets = [14, 0], sizes = [2, 128], strides = [1, 1]} : vector<16x256xf32> to vector<2x128xf32>
    %263 = vector.extract_strided_slice %8 {offsets = [0, 128], sizes = [2, 128], strides = [1, 1]} : vector<16x256xf32> to vector<2x128xf32>
    %cst_40 = arith.constant dense<0.000000e+00> : vector<2x128xf32>
    %264 = tpu.matmul %246, %0, %cst_40 {dimension_numbers = #tpu.dot_dimension_numbers<[1], [0], [0], [1], [0, 0, 1, 1], [], []>} : vector<2x32xf32>, vector<32x128xf32>, vector<2x128xf32> -> vector<2x128xf32>
    %265 = arith.addf %262, %264 : vector<2x128xf32>
    %cst_41 = arith.constant dense<0.000000e+00> : vector<2x128xf32>
    %266 = tpu.matmul %261, %1, %cst_41 {dimension_numbers = #tpu.dot_dimension_numbers<[1], [0], [0], [1], [0, 0, 1, 1], [], []>} : vector<2x32xf32>, vector<32x128xf32>, vector<2x128xf32> -> vector<2x128xf32>
    %267 = arith.addf %263, %266 : vector<2x128xf32>
    %268 = arith.negf %265 : vector<2x128xf32>
    %269 = math.exp %268 : vector<2x128xf32>
    %cst_42 = arith.constant 1.000000e+00 : f32
    %270 = vector.broadcast %cst_42 : f32 to vector<2x128xf32>
    %271 = arith.addf %270, %269 : vector<2x128xf32>
    %272 = arith.divf %270, %271 : vector<2x128xf32>
    %273 = math.tanh %265 : vector<2x128xf32>
    %274 = vector.extract_strided_slice %272 {offsets = [0, 0], sizes = [2, 32], strides = [1, 1]} : vector<2x128xf32> to vector<2x32xf32>
    %275 = vector.extract_strided_slice %272 {offsets = [0, 32], sizes = [2, 32], strides = [1, 1]} : vector<2x128xf32> to vector<2x32xf32>
    %276 = vector.extract_strided_slice %273 {offsets = [0, 64], sizes = [2, 32], strides = [1, 1]} : vector<2x128xf32> to vector<2x32xf32>
    %277 = vector.extract_strided_slice %272 {offsets = [0, 96], sizes = [2, 32], strides = [1, 1]} : vector<2x128xf32> to vector<2x32xf32>
    %278 = arith.mulf %275, %244 : vector<2x32xf32>
    %279 = arith.mulf %274, %276 : vector<2x32xf32>
    %280 = arith.addf %278, %279 : vector<2x32xf32>
    %281 = math.tanh %280 : vector<2x32xf32>
    %282 = arith.mulf %277, %281 : vector<2x32xf32>
    %283 = arith.negf %267 : vector<2x128xf32>
    %284 = math.exp %283 : vector<2x128xf32>
    %cst_43 = arith.constant 1.000000e+00 : f32
    %285 = vector.broadcast %cst_43 : f32 to vector<2x128xf32>
    %286 = arith.addf %285, %284 : vector<2x128xf32>
    %287 = arith.divf %285, %286 : vector<2x128xf32>
    %288 = math.tanh %267 : vector<2x128xf32>
    %289 = vector.extract_strided_slice %287 {offsets = [0, 0], sizes = [2, 32], strides = [1, 1]} : vector<2x128xf32> to vector<2x32xf32>
    %290 = vector.extract_strided_slice %287 {offsets = [0, 32], sizes = [2, 32], strides = [1, 1]} : vector<2x128xf32> to vector<2x32xf32>
    %291 = vector.extract_strided_slice %288 {offsets = [0, 64], sizes = [2, 32], strides = [1, 1]} : vector<2x128xf32> to vector<2x32xf32>
    %292 = vector.extract_strided_slice %287 {offsets = [0, 96], sizes = [2, 32], strides = [1, 1]} : vector<2x128xf32> to vector<2x32xf32>
    %293 = arith.mulf %290, %259 : vector<2x32xf32>
    %294 = arith.mulf %289, %291 : vector<2x32xf32>
    %295 = arith.addf %293, %294 : vector<2x32xf32>
    %296 = math.tanh %295 : vector<2x32xf32>
    %297 = arith.mulf %292, %296 : vector<2x32xf32>
    %298 = tpu.concatenate %30, %297 in 1 : vector<2x32xf32>, vector<2x32xf32> -> vector<2x64xf32>
    %299 = tpu.concatenate %66, %261 in 1 : vector<2x32xf32>, vector<2x32xf32> -> vector<2x64xf32>
    %300 = tpu.concatenate %102, %225 in 1 : vector<2x32xf32>, vector<2x32xf32> -> vector<2x64xf32>
    %301 = tpu.concatenate %138, %189 in 1 : vector<2x32xf32>, vector<2x32xf32> -> vector<2x64xf32>
    %302 = tpu.concatenate %174, %153 in 1 : vector<2x32xf32>, vector<2x32xf32> -> vector<2x64xf32>
    %303 = tpu.concatenate %210, %117 in 1 : vector<2x32xf32>, vector<2x32xf32> -> vector<2x64xf32>
    %304 = tpu.concatenate %246, %81 in 1 : vector<2x32xf32>, vector<2x32xf32> -> vector<2x64xf32>
    %305 = tpu.concatenate %282, %45 in 1 : vector<2x32xf32>, vector<2x32xf32> -> vector<2x64xf32>
    %306 = vector.broadcast %2 : vector<1x64xf32> to vector<2x64xf32>
    %307 = arith.mulf %298, %306 : vector<2x64xf32>
    %cst_44 = arith.constant dense<0.000000e+00> : vector<2xf32>
    %308 = vector.multi_reduction <add>, %307, %cst_44 [1] : vector<2x64xf32> to vector<2xf32>
    %309 = vector.shape_cast %308 : vector<2xf32> to vector<2x1xf32>
    %310 = vector.broadcast %2 : vector<1x64xf32> to vector<2x64xf32>
    %311 = arith.mulf %299, %310 : vector<2x64xf32>
    %cst_45 = arith.constant dense<0.000000e+00> : vector<2xf32>
    %312 = vector.multi_reduction <add>, %311, %cst_45 [1] : vector<2x64xf32> to vector<2xf32>
    %313 = vector.shape_cast %312 : vector<2xf32> to vector<2x1xf32>
    %314 = vector.broadcast %2 : vector<1x64xf32> to vector<2x64xf32>
    %315 = arith.mulf %300, %314 : vector<2x64xf32>
    %cst_46 = arith.constant dense<0.000000e+00> : vector<2xf32>
    %316 = vector.multi_reduction <add>, %315, %cst_46 [1] : vector<2x64xf32> to vector<2xf32>
    %317 = vector.shape_cast %316 : vector<2xf32> to vector<2x1xf32>
    %318 = vector.broadcast %2 : vector<1x64xf32> to vector<2x64xf32>
    %319 = arith.mulf %301, %318 : vector<2x64xf32>
    %cst_47 = arith.constant dense<0.000000e+00> : vector<2xf32>
    %320 = vector.multi_reduction <add>, %319, %cst_47 [1] : vector<2x64xf32> to vector<2xf32>
    %321 = vector.shape_cast %320 : vector<2xf32> to vector<2x1xf32>
    %322 = vector.broadcast %2 : vector<1x64xf32> to vector<2x64xf32>
    %323 = arith.mulf %302, %322 : vector<2x64xf32>
    %cst_48 = arith.constant dense<0.000000e+00> : vector<2xf32>
    %324 = vector.multi_reduction <add>, %323, %cst_48 [1] : vector<2x64xf32> to vector<2xf32>
    %325 = vector.shape_cast %324 : vector<2xf32> to vector<2x1xf32>
    %326 = vector.broadcast %2 : vector<1x64xf32> to vector<2x64xf32>
    %327 = arith.mulf %303, %326 : vector<2x64xf32>
    %cst_49 = arith.constant dense<0.000000e+00> : vector<2xf32>
    %328 = vector.multi_reduction <add>, %327, %cst_49 [1] : vector<2x64xf32> to vector<2xf32>
    %329 = vector.shape_cast %328 : vector<2xf32> to vector<2x1xf32>
    %330 = vector.broadcast %2 : vector<1x64xf32> to vector<2x64xf32>
    %331 = arith.mulf %304, %330 : vector<2x64xf32>
    %cst_50 = arith.constant dense<0.000000e+00> : vector<2xf32>
    %332 = vector.multi_reduction <add>, %331, %cst_50 [1] : vector<2x64xf32> to vector<2xf32>
    %333 = vector.shape_cast %332 : vector<2xf32> to vector<2x1xf32>
    %334 = vector.broadcast %2 : vector<1x64xf32> to vector<2x64xf32>
    %335 = arith.mulf %305, %334 : vector<2x64xf32>
    %cst_51 = arith.constant dense<0.000000e+00> : vector<2xf32>
    %336 = vector.multi_reduction <add>, %335, %cst_51 [1] : vector<2x64xf32> to vector<2xf32>
    %337 = vector.shape_cast %336 : vector<2xf32> to vector<2x1xf32>
    %338 = tpu.concatenate %309, %313, %317, %321, %325, %329, %333, %337 in 1 : vector<2x1xf32>, vector<2x1xf32>, vector<2x1xf32>, vector<2x1xf32>, vector<2x1xf32>, vector<2x1xf32>, vector<2x1xf32>, vector<2x1xf32> -> vector<2x8xf32>
    %cst_52 = arith.constant dense<0xFF800000> : vector<2xf32>
    %339 = vector.multi_reduction <maximumf>, %338, %cst_52 [1] : vector<2x8xf32> to vector<2xf32>
    %340 = vector.shape_cast %339 : vector<2xf32> to vector<2x1xf32>
    %341 = vector.broadcast %340 : vector<2x1xf32> to vector<2x8xf32>
    %342 = arith.subf %338, %341 : vector<2x8xf32>
    %343 = math.exp %342 : vector<2x8xf32>
    %cst_53 = arith.constant dense<0.000000e+00> : vector<2xf32>
    %344 = vector.multi_reduction <add>, %343, %cst_53 [1] : vector<2x8xf32> to vector<2xf32>
    %345 = vector.shape_cast %344 : vector<2xf32> to vector<2x1xf32>
    %346 = vector.broadcast %345 : vector<2x1xf32> to vector<2x8xf32>
    %347 = arith.divf %343, %346 : vector<2x8xf32>
    %348 = vector.extract_strided_slice %347 {offsets = [0, 0], sizes = [2, 1], strides = [1, 1]} : vector<2x8xf32> to vector<2x1xf32>
    %349 = vector.broadcast %348 : vector<2x1xf32> to vector<2x64xf32>
    %350 = arith.mulf %349, %298 : vector<2x64xf32>
    %351 = vector.extract_strided_slice %347 {offsets = [0, 1], sizes = [2, 1], strides = [1, 1]} : vector<2x8xf32> to vector<2x1xf32>
    %352 = vector.broadcast %351 : vector<2x1xf32> to vector<2x64xf32>
    %353 = arith.mulf %352, %299 : vector<2x64xf32>
    %354 = vector.extract_strided_slice %347 {offsets = [0, 2], sizes = [2, 1], strides = [1, 1]} : vector<2x8xf32> to vector<2x1xf32>
    %355 = vector.broadcast %354 : vector<2x1xf32> to vector<2x64xf32>
    %356 = arith.mulf %355, %300 : vector<2x64xf32>
    %357 = vector.extract_strided_slice %347 {offsets = [0, 3], sizes = [2, 1], strides = [1, 1]} : vector<2x8xf32> to vector<2x1xf32>
    %358 = vector.broadcast %357 : vector<2x1xf32> to vector<2x64xf32>
    %359 = arith.mulf %358, %301 : vector<2x64xf32>
    %360 = vector.extract_strided_slice %347 {offsets = [0, 4], sizes = [2, 1], strides = [1, 1]} : vector<2x8xf32> to vector<2x1xf32>
    %361 = vector.broadcast %360 : vector<2x1xf32> to vector<2x64xf32>
    %362 = arith.mulf %361, %302 : vector<2x64xf32>
    %363 = vector.extract_strided_slice %347 {offsets = [0, 5], sizes = [2, 1], strides = [1, 1]} : vector<2x8xf32> to vector<2x1xf32>
    %364 = vector.broadcast %363 : vector<2x1xf32> to vector<2x64xf32>
    %365 = arith.mulf %364, %303 : vector<2x64xf32>
    %366 = vector.extract_strided_slice %347 {offsets = [0, 6], sizes = [2, 1], strides = [1, 1]} : vector<2x8xf32> to vector<2x1xf32>
    %367 = vector.broadcast %366 : vector<2x1xf32> to vector<2x64xf32>
    %368 = arith.mulf %367, %304 : vector<2x64xf32>
    %369 = vector.extract_strided_slice %347 {offsets = [0, 7], sizes = [2, 1], strides = [1, 1]} : vector<2x8xf32> to vector<2x1xf32>
    %370 = vector.broadcast %369 : vector<2x1xf32> to vector<2x64xf32>
    %371 = arith.mulf %370, %305 : vector<2x64xf32>
    %372 = arith.addf %350, %353 : vector<2x64xf32>
    %373 = arith.addf %356, %359 : vector<2x64xf32>
    %374 = arith.addf %362, %365 : vector<2x64xf32>
    %375 = arith.addf %368, %371 : vector<2x64xf32>
    %376 = arith.addf %372, %373 : vector<2x64xf32>
    %377 = arith.addf %374, %375 : vector<2x64xf32>
    %378 = arith.addf %376, %377 : vector<2x64xf32>
    %c0_54 = arith.constant 0 : index
    %c0_55 = arith.constant 0 : index
    %379 = vector.load %arg6[%c0_54, %c0_55] : memref<64x4xf32, #tpu.memory_space<vmem>>, vector<64x4xf32>
    %cst_56 = arith.constant dense<0.000000e+00> : vector<2x4xf32>
    %380 = tpu.matmul %378, %379, %cst_56 {dimension_numbers = #tpu.dot_dimension_numbers<[1], [0], [0], [1], [0, 0, 1, 1], [], []>} : vector<2x64xf32>, vector<64x4xf32>, vector<2x4xf32> -> vector<2x4xf32>
    %c0_57 = arith.constant 0 : index
    %c0_58 = arith.constant 0 : index
    %381 = vector.load %arg7[%c0_57, %c0_58] : memref<1x4xf32, #tpu.memory_space<vmem>>, vector<1x4xf32>
    %382 = vector.broadcast %381 : vector<1x4xf32> to vector<2x4xf32>
    %383 = arith.addf %380, %382 : vector<2x4xf32>
    %c0_59 = arith.constant 0 : index
    %c0_60 = arith.constant 0 : index
    %384 = vector.load %arg8[%c0_59, %c0_60] : memref<2x4xf32, #tpu.memory_space<vmem>>, vector<2x4xf32>
    tpu.vector_store %arg8[%c0_59, %c0_60], %383 {strides = array<i32>} : memref<2x4xf32, #tpu.memory_space<vmem>>, vector<2x4xf32>,
    return
  }
}

</mosaic_0001>

<bundles_post_ra>
// kernel: tpu_custom_call.1
= control target key start
LH: loop header
LB: loop body
LE: loop exit
PB: predicated region body
PF: predicated region fallthrough
CT: control target
= control target key end

     0   :  { %13 = vsyncpa [#allocation3], 0  ;;  %s3425_s0 = inlined_call_operand.hbm [shape: f32[16,32], index: 0, kind: input, shape index: {}]   ;;  %s3426_s1 = inlined_call_operand.vmem [shape: f32[32,256], index: 1, kind: input, shape index: {}]   ;;  %s3427_s2 = inlined_call_operand.hbm [shape: f32[32,128], index: 2, kind: input, shape index: {}]   ;;  %s3428_s3 = inlined_call_operand.hbm [shape: f32[32,128], index: 3, kind: input, shape index: {}]   ;;  %s3429_s4 = inlined_call_operand.vmem [shape: f32[1,256], index: 4, kind: input, shape index: {}]   ;;  %s3430_s5 = inlined_call_operand.vmem [shape: f32[1,64], index: 5, kind: input, shape index: {}]   ;;  %s3431_s6 = inlined_call_operand.vmem [shape: f32[64,4], index: 6, kind: input, shape index: {}]   ;;  %s3432_s7 = inlined_call_operand.vmem [shape: f32[1,4], index: 7, kind: input, shape index: {}]   ;;  %s3433_s8 = inlined_call_operand.hbm [shape: f32[2,4], index: 8, kind: output, shape index: {}]  }
   0x1   :  { %14 = vsyncpa [#allocation6], 0 }
   0x2   :  { %15 = vsyncpa [#allocation4], 0  ;;  %s2870_s27 = smov [#allocation5]   ;;  %s2871_s29 = smov [#allocation2]  }
   0x3   :  { %s35_s28 = sshll.u32 %s2870_s27, 4  ;;  %s21_s30 = sshll.u32 %s2871_s29, 4  ;;  %s36_s28 = int_to_ptr.vmem [resolvable:$true] %s35_s28  ;;  %s2934_s30 = int_to_ptr.vmem [resolvable:$true] %s21_s30 }
   0x4   :  { %s2776_s11 = scalar_lea.hbm %s3427_s2, 512 }
   0x5   :  { %p2777_p0 = scmp.ne.s32.totalorder %s3427_s2, %s2776_s11  ;;  %p2780_p1 = scmp.lt.u32.totalorder %s2776_s11, %s3427_s2 }
   0x7   :  { %p2782_p2 = pnand %p2780_p1, %p2777_p0 }
   0x9   :  { %2785 = shalt.err (!%p2782_p2)
}
   0xa   :  { %s2786_s16 = scalar_lea.vmem %s36_s28, 512  ;;  %p2791_p4 = scmp.lt.s32.totalorder %s36_s28, %s36_s28 }
   0xb   :  { %p2787_p3 = scmp.ne.s32.totalorder %s36_s28, %s2786_s16  ;;  %p2792_p5 = scmp.lt.s32.totalorder %s2786_s16, %s2786_s16 }
   0xd   :  { %p2793_p6 = por %p2792_p5, %p2791_p4 }
   0xf   :  { %p2794_p7 = pnand %p2793_p6, %p2787_p3 }
  0x11   :  { %2797 = shalt.err (!%p2794_p7)
}
  0x12   :  { %s2872_s17 = smov 128   ;;  %s2873_s18 = smov 8  }
  0x13   :  { %41 = dma.hbm_to_vmem [thread:$0]  %s3427_s2, 512, %s36_s28, [#allocation6], %s2872_s17, %s2872_s17, %s2873_s18  }
  0x14   :  { %s2798_s23 = scalar_lea.hbm %s3425_s0, 256 }
  0x15   :  { %p2799_p8 = scmp.ne.s32.totalorder %s3425_s0, %s2798_s23  ;;  %p2802_p9 = scmp.lt.u32.totalorder %s2798_s23, %s3425_s0 }
  0x17   :  { %p2804_p10 = pnand %p2802_p9, %p2799_p8 }
  0x19   :  { %2807 = shalt.err (!%p2804_p10)
}
  0x1a   :  { %s2808_s29 = scalar_lea.vmem %s2934_s30, 256  ;;  %p2813_p12 = scmp.lt.s32.totalorder %s2934_s30, %s2934_s30 }
  0x1b   :  { %p2809_p11 = scmp.ne.s32.totalorder %s2934_s30, %s2808_s29  ;;  %p2814_p13 = scmp.lt.s32.totalorder %s2808_s29, %s2808_s29 }
  0x1d   :  { %p2815_p0 = por %p2814_p13, %p2813_p12 }
  0x1f   :  { %p2816_p1 = pnand %p2815_p0, %p2809_p11 }
  0x21   :  { %2819 = shalt.err (!%p2816_p1)
}
  0x22   :  { %27 = dma.hbm_to_vmem [thread:$0]  %s3425_s0, 256, %s2934_s30, [#allocation3], %s2872_s17, %s2872_s17, %s2873_s18  }
  0x23   :  { %s2874_s9 = smov [#allocation7]   ;;  %s2820_s13 = scalar_lea.hbm %s3428_s3, 512 }
  0x24   :  { %s47_s10 = sshll.u32 %s2874_s9, 4  ;;  %p2821_p2 = scmp.ne.s32.totalorder %s3428_s3, %s2820_s13  ;;  %s48_s10 = int_to_ptr.vmem [resolvable:$true] %s47_s10 }
  0x25   :  { %p2824_p3 = scmp.lt.u32.totalorder %s2820_s13, %s3428_s3 }
  0x27   :  { %p2826_p4 = pnand %p2824_p3, %p2821_p2 }
  0x29   :  { %2829 = shalt.err (!%p2826_p4)
}
  0x2a   :  { %s2830_s20 = scalar_lea.vmem %s48_s10, 512  ;;  %p2835_p6 = scmp.lt.s32.totalorder %s48_s10, %s48_s10 }
  0x2b   :  { %p2831_p5 = scmp.ne.s32.totalorder %s48_s10, %s2830_s20  ;;  %p2836_p7 = scmp.lt.s32.totalorder %s2830_s20, %s2830_s20 }
  0x2d   :  { %p2837_p8 = por %p2836_p7, %p2835_p6 }
  0x2f   :  { %p2838_p9 = pnand %p2837_p8, %p2831_p5 }
  0x31   :  { %2841 = shalt.err (!%p2838_p9)
}
  0x32   :  { %53 = dma.hbm_to_vmem [thread:$0]  %s3428_s3, 512, %s48_s10, [#allocation6], %s2872_s17, %s2872_s17, %s2873_s18  }
  0x33   :  { %2864 = dma.done.wait [#allocation3], 256  }
  0x34   :  { %2865 = vsyncadd [#allocation3], 4294967040 }
  0x35   :  { %2866 = dma.done.wait [#allocation6], 1024  }
  0x36   :  { %2867 = vsyncadd [#allocation6], 4294966272  ;;  %v2875_v0 = vmov 0.0|0.0   ;;  %v2876_v1 = vmov 0.0   ;;  %vm2877_vm0 = vmmov 0   ;;  %v83_v2 = vld [vmem:[%s3426_s1 + $0x8] sm:$0xff]  ;;  %v92_v28 = vlaneseq }
  0x37   :  { %2508 = vmatprep.subr.bf16.mxu1 %v2875_v0  ;;  %173 = vmatprep.mubr.f32.mxu0 %v2876_v1  ;;  %v85_v3 = vld [vmem:[%s3426_s1 + $0x18] sm:$0xff]  ;;  %v82_v4 = vld [vmem:[%s3426_s1] sm:$0xff]  ;;  %v84_v6 = vld [vmem:[%s3426_s1 + $0x10] sm:$0xff]  ;;  %vm102_vm1 = vcmask 261120   ;;  %s2879_s13 = smov 32   ;;  %vm1939_vm2 = vcmask 521220  }
  0x38   :  { %2313 = vmatprep.mubr.msk.f32.mxu1 %vm2877_vm0, %v2876_v1  ;;  %v2500_v5 = vpack.c.bf16 %v85_v3, %v83_v2  ;;  %v87_v7 = vld [vmem:[%s3426_s1 + $0x28] sm:$0xff]  ;;  %v89_v8 = vld [vmem:[%s3426_s1 + $0x38] sm:$0xff]  ;;  %v2502_v9 = vpack.c.bf16 %v84_v6, %v82_v4  ;;  %v71_v11 = vld [vmem:[#allocation5] sm:$0xff]  ;;  %v93_v29 = vshrl.u32 %v92_v28, 7  ;;  %vm1934_vm3 = vcmask 519170   ;;  %s2888_s2 = smov [#allocation8]  }
  0x39   :  { %v2504_v10 = vpack.c.bf16 %v89_v8, %v87_v7  ;;  %v72_v12 = vld [vmem:[#allocation5 + $0x8] sm:$0xff]  ;;  %v86_v13 = vld [vmem:[%s3426_s1 + $0x20] sm:$0xff]  ;;  %v88_v15 = vld [vmem:[%s3426_s1 + $0x30] sm:$0xff]  ;;  %vm1944_vm4 = vcmask 523270   ;;  %vm1929_vm5 = vcmask 517120   ;;  %vm1982_vm6 = vcmask 7168  }
  0x3a   :  { %2501 = vmatprep.subr.bf16.mxu0 %v2500_v5  ;;  %v3011_v14 = vpack.c.bf16 %v72_v12, %v71_v11  ;;  %v73_v16 = vld [vmem:[#allocation5 + $0x10] sm:$0xff]  ;;  %v2506_v17 = vpack.c.bf16 %v88_v15, %v86_v13  ;;  %v74_v18 = vld [vmem:[#allocation5 + $0x18] sm:$0xff]  ;;  %v75_v20 = vld [vmem:[#allocation7] sm:$0xff]  ;;  %v98_v30 = vsub.s32 1, %v93_v29  ;;  %v94_v33 = vsub.s32 0, %v93_v29  ;;  %s2171_s28 = sshll.u32 %s2888_s2, 4  ;;  %s2172_s28 = int_to_ptr.vmem [resolvable:$true] %s2171_s28 }
  0x3b   :  { %2503 = vmatpush1.bf16.msra.mxu0 %v2502_v9  ;;  %v3017_v19 = vpack.c.bf16 %v74_v18, %v73_v16  ;;  %v76_v21 = vld [vmem:[#allocation7 + $0x8] sm:$0xff]  ;;  %v80_v22 = vld [vmem:[#allocation2] sm:$0xff]  ;;  %v78_v25 = vld [vmem:[#allocation7 + $0x18] sm:$0xff]  ;;  %vm1984_vm7 = vcmask 15360   ;;  %vm1986_vm8 = vcmask 23552   ;;  %vm1988_vm9 = vcmask 31744   ;;  %p2847_p11 = scmp.lt.s32.totalorder %s2172_s28, %s2172_s28 }
  0x3c   :  { %2505 = vmatprep.subr.bf16.mxu0 %v2504_v10  ;;  %2510 = vmatpush3.bf16.msra.mxu1 %v3011_v14  ;;  %v3020_v23 = vpack.c.bf16 %v76_v21, %v75_v20  ;;  %v77_v24 = vld [vmem:[#allocation7 + $0x10] sm:$0xff]  ;;  %v81_v26 = vld [vmem:[#allocation2 + $0x8] sm:$0xff]  ;;  %vm1990_vm10 = vcmask 39936   ;;  %vm1992_vm11 = vcmask 48128   ;;  %vm1994_vm12 = vcmask 56320   ;;  %s2842_s9 = scalar_lea.vmem %s2172_s28, 32 }
  0x3d   :  { %2511 = vmatprep.subr.bf16.mxu1 %v2875_v0  ;;  %v3028_v27 = vpack.c.bf16 %v78_v25, %v77_v24  ;;  %v90_v31 = vld [vmem:[%s3429_s4] sm:$0x3]  ;;  %s2878_s4 = smov 64   ;;  %vm1996_vm13 = vcmask 58368   ;;  %vm2089_vm14 = vcmask 523264   ;;  %vm2163_vm15 = vcmask 25600   ;;  %p2843_p10 = scmp.ne.s32.totalorder %s2172_s28, %s2842_s9 }
  0x3e   :  { %v99_v32 = vrot.slane %v90_v31, %v98_v30  ;;  %v95_v38 = vrot.slane %v90_v31, %v94_v33  ;;  %p2848_p12 = scmp.lt.s32.totalorder %s2842_s9, %s2842_s9 }
  0x3f   :  { %2507 = vmatpush1.bf16.msra.mxu0 %v2506_v17 }
  0x40   :  { %2513 = vmatpush3.bf16.msra.mxu1 %v3017_v19  ;;  %2514 = vmatprep.subr.bf16.mxu0 %v2875_v0  ;;  %p2849_p13 = por %p2848_p12, %p2847_p11 }
  0x41   :  { %2520 = vmatprep.subr.bf16.mxu1 %v2875_v0 }
  0x42   :  { %2181 = vmatmul.mubr.msk.f32.vlgmr.msra.gmra.mrb[0].mxu0 %vm102_vm1, %v80_v22  ;;  %p2850_p0 = pnand %p2849_p13, %p2843_p10 }
  0x43   :  { %2516 = vmatpush3.bf16.msra.mxu0 %v3020_v23  ;;  %179 = vmatprep.mubr.f32.mxu0 %v2876_v1 }
  0x44   :  { %2314 = vmatmul.mubr.f32.vlgmr.msra.gmra.mrb[0].mxu1 %v2876_v1  ;;  %2517 = vmatprep.subr.bf16.mxu0 %v2875_v0 }
  0x45   :  { %2522 = vmatpush3.bf16.msra.mxu1 %v3011_v14  ;;  %2335 = vmatprep.mubr.msk.f32.mxu1 %vm2877_vm0, %v2876_v1 }
  0x46   :  { %2182 = vmatmul.mubr.msk.f32.gmra.mrb[2].mxu0 %vm102_vm1, %v81_v26  ;;  %2523 = vmatprep.subr.bf16.mxu1 %v2875_v0 }
  0x47   :  { %2519 = vmatpush3.bf16.msra.mxu0 %v3028_v27  ;;  %2324 = vmatprep.mubr.msk.f32.mxu0 %vm2877_vm0, %v2876_v1 }
  0x48   :  { %2526 = vmatprep.subr.bf16.mxu0 %v2875_v0 }
  0x49   :  { %2525 = vmatpush3.bf16.msra.mxu1 %v3017_v19 }
  0x4a   :  { %2325 = vmatmul.mubr.f32.vlgmr.msra.gmra.mrb[4].mxu0 %v2876_v1  ;;  %2532 = vmatprep.subr.bf16.mxu1 %v2875_v0 }
  0x4b   :  { %2528 = vmatpush3.bf16.msra.mxu0 %v3020_v23  ;;  %2346 = vmatprep.mubr.msk.f32.mxu0 %vm2877_vm0, %v2876_v1 }
  0x4c   :  { %2529 = vmatprep.subr.bf16.mxu0 %v2875_v0 }
  0x4f   :  { %2531 = vmatpush3.bf16.msra.mxu0 %v3028_v27 }
  0x50   :  { %2538 = vmatprep.subr.bf16.mxu0 %v2875_v0 }
 0x115   :  { %v175_v34 = vpop.f32.mrb[0].mxu0 }
 0x116   :  { %v177_v35 = vpop.f32.mrb[1].mxu0  ;;  %v3057_v44 = vadd.f32 %v175_v34, %v95_v38 }
 0x117   :  { %v3053_v36 = vadd.f32 %v177_v35, %v99_v32  ;;  %v255_v37 = vpop.f32.mrb[0].mxu1 }
 0x118   :  { %v2315_v39 = vpop.f32.mrb[1].mxu1  ;;  %v259_v49 = vadd.f32 %v255_v37, %v3057_v44 }
 0x119   :  { %v181_v40 = vpop.f32.mrb[2].mxu0 }
 0x11a   :  { %v3055_v41 = vadd.f32 %v181_v40, %v95_v38  ;;  %v183_v42 = vpop.f32.mrb[3].mxu0  ;;  %v2183_v53 = vmul.f32 -1.442695, %v259_v49 }
 0x11b   :  { %v3059_v45 = vadd.f32 %v183_v42, %v99_v32 }
 0x11d   :  { %v326_v43 = vpop.f32.mrb[4].mxu0 }
 0x11e   :  { %v331_v46 = vrot.slane %v326_v43, 2  ;;  %v2326_v47 = vpop.f32.mrb[5].mxu0 }
 0x120   :  { %v333_v48 = vadd.f32 %v331_v46, %v3059_v45 }
 0x122   :  { %2644 = vtanh.f32 %v333_v48  ;;  %v2184_v52 = vmul.f32 -1.442695, %v333_v48 }
 0x123   :  { %2646 = vtanh.f32 %v259_v49 }
 0x124   :  { %2648 = vpow2.f32 %v2184_v52 }
 0x125   :  { %2650 = vpow2.f32 %v2183_v53 }
 0x12c   :  { %v2645_v50 = vpop.eup %2644 }
 0x12d   :  { %367 = vrot.lane.b32.xlu0 %v2645_v50, %s2878_s4  ;;  %v2647_v51 = vpop.eup %2646 }
 0x12e   :  { %v2649_v54 = vpop.eup %2648 }
 0x12f   :  { %v361_v55 = vadd.f32 1.0, %v2649_v54  ;;  %v2651_v56 = vpop.eup %2650 }
 0x130   :  { %v337_v57 = vadd.f32 1.0, %v2651_v56 }
 0x131   :  { %343 = vrot.lane.b32.xlu0 %v2647_v51, %s2878_s4  ;;  %2652 = vrcp.f32 %v361_v55 }
 0x132   :  { %2654 = vrcp.f32 %v337_v57 }
 0x13b   :  { %v2653_v58 = vpop.eup %2652 }
 0x13c   :  { %v2655_v61 = vpop.eup %2654  ;;  %v365_v2 = vmul.f32 0.0, %v2653_v58 }
 0x13d   :  { %v341_v5 = vmul.f32 0.0, %v2655_v61 }
 0x19f   :  { %v368_v59 = vpop.permute.xlu0 %367 }
 0x1a0   :  { %v370_v60 = vmul.f32 %v2653_v58, %v368_v59 }
 0x1a2   :  { %372 = vrot.lane.b32.xlu1 %v370_v60, %s2879_s13 }
 0x1a3   :  { %v344_v62 = vpop.permute.xlu0 %343 }
 0x1a4   :  { %v346_v63 = vmul.f32 %v2655_v61, %v344_v62 }
 0x1a6   :  { %348 = vrot.lane.b32.xlu1 %v346_v63, %s2879_s13 }
 0x214   :  { %v373_v3 = vpop.permute.xlu1 %372 }
 0x215   :  { %v3067_v4 = vadd.f32 %v373_v3, %v365_v2 }
 0x217   :  { %2656 = vtanh.f32 %v3067_v4  ;;  %v576_v47 = vrot.slane %v3067_v4, 2 }
 0x218   :  { %v349_v6 = vpop.permute.xlu1 %348 }
 0x219   :  { %v3070_v7 = vadd.f32 %v349_v6, %v341_v5 }
 0x21b   :  { %2658 = vtanh.f32 %v3070_v7  ;;  %v549_v49 = vrot.slane %v3070_v7, 6 }
 0x221   :  { %v2657_v8 = vpop.eup %2656 }
 0x222   :  { %378 = vrot.lane.b32.xlu0 %v2657_v8, %s2878_s4 }
 0x225   :  { %v2659_v9 = vpop.eup %2658 }
 0x226   :  { %354 = vrot.lane.b32.xlu1 %v2659_v9, %s2878_s4 }
 0x294   :  { %v379_v10 = vpop.permute.xlu0 %378 }
 0x295   :  { %v3075_v11 = vmul.f32 %v2653_v58, %v379_v10 }
 0x297   :  { %v462_v12 = vrot.slane %v3075_v11, 6 }
 0x298   :  { %v355_v13 = vpop.permute.xlu1 %354 }
 0x299   :  { %v357_v15 = vmul.f32 %v2655_v61, %v355_v13  ;;  %463 = vrot.lane.b32.xlu0 %v462_v12, %s2879_s13 }
 0x29b   :  { %383 = vrot.lane.b32.xlu1 %v357_v15, %s2879_s13 }
 0x30b   :  { %v464_v16 = vpop.permute.xlu0 %463 }
 0x30c   :  { %2347 = vmatmul.mubr.msk.f32.vlgmr.msra.gmra.mrb[6].mxu0 %vm102_vm1, %v464_v16 }
 0x30d   :  { %v3081_v17 = vpop.permute.xlu1 %383  ;;  %2540 = vmatpush3.bf16.msra.mxu0 %v3020_v23  ;;  %2368 = vmatprep.mubr.msk.f32.mxu0 %vm2877_vm0, %v2876_v1 }
 0x30e   :  { %2336 = vmatmul.mubr.msk.f32.vlgmr.msra.gmra.mrb[2].mxu1 %vm102_vm1, %v3081_v17  ;;  %2541 = vmatprep.subr.bf16.mxu0 %v2875_v0 }
 0x30f   :  { %2534 = vmatpush3.bf16.msra.mxu1 %v3011_v14  ;;  %2357 = vmatprep.mubr.msk.f32.mxu1 %vm2877_vm0, %v2876_v1 }
 0x310   :  { %2535 = vmatprep.subr.bf16.mxu1 %v2875_v0 }
 0x311   :  { %2543 = vmatpush3.bf16.msra.mxu0 %v3028_v27 }
 0x312   :  { %2550 = vmatprep.subr.bf16.mxu0 %v2875_v0 }
 0x313   :  { %2537 = vmatpush3.bf16.msra.mxu1 %v3017_v19 }
 0x314   :  { %2544 = vmatprep.subr.bf16.mxu1 %v2875_v0 }
 0x3df   :  { %v533_v18 = vpop.f32.mrb[6].mxu0 }
 0x3e0   :  { %v538_v20 = vrot.slane %v533_v18, 4  ;;  %v2348_v21 = vpop.f32.mrb[7].mxu0 }
 0x3e1   :  { %v453_v22 = vpop.f32.mrb[2].mxu1 }
 0x3e2   :  { %v540_v24 = vadd.f32 %v538_v20, %v3059_v45  ;;  %v458_v25 = vrot.slane %v453_v22, 6  ;;  %v2337_v26 = vpop.f32.mrb[3].mxu1 }
 0x3e4   :  { %2660 = vtanh.f32 %v540_v24  ;;  %v460_v28 = vadd.f32 %v458_v25, %v3057_v44  ;;  %v2188_v31 = vmul.f32 -1.442695, %v540_v24 }
 0x3e6   :  { %2662 = vtanh.f32 %v460_v28  ;;  %v2187_v32 = vmul.f32 -1.442695, %v460_v28 }
 0x3e7   :  { %2664 = vpow2.f32 %v2188_v31 }
 0x3e8   :  { %2666 = vpow2.f32 %v2187_v32 }
 0x3ee   :  { %v2661_v29 = vpop.eup %2660 }
 0x3ef   :  { %580 = vrot.lane.b32.xlu0 %v2661_v29, %s2878_s4 }
 0x3f0   :  { %v2663_v30 = vpop.eup %2662 }
 0x3f1   :  { %553 = vrot.lane.b32.xlu1 %v2663_v30, %s2878_s4  ;;  %v2665_v33 = vpop.eup %2664 }
 0x3f2   :  { %v2667_v34 = vpop.eup %2666  ;;  %v571_v35 = vadd.f32 1.0, %v2665_v33 }
 0x3f3   :  { %v544_v37 = vadd.f32 1.0, %v2667_v34 }
 0x3f4   :  { %2668 = vrcp.f32 %v571_v35 }
 0x3f5   :  { %2670 = vrcp.f32 %v544_v37 }
 0x3fe   :  { %v2669_v38 = vpop.eup %2668 }
 0x3ff   :  { %v2671_v42 = vpop.eup %2670  ;;  %v578_v48 = vmul.f32 %v2669_v38, %v576_v47 }
 0x400   :  { %v551_v52 = vmul.f32 %v2671_v42, %v549_v49 }
 0x461   :  { %v581_v39 = vpop.permute.xlu0 %580 }
 0x462   :  { %v583_v40 = vmul.f32 %v2669_v38, %v581_v39 }
 0x463   :  { %v554_v43 = vpop.permute.xlu1 %553 }
 0x464   :  { %585 = vrot.lane.b32.xlu0 %v583_v40, %s2879_s13  ;;  %v556_v46 = vmul.f32 %v2671_v42, %v554_v43 }
 0x466   :  { %558 = vrot.lane.b32.xlu1 %v556_v46, %s2879_s13 }
 0x4d6   :  { %v586_v50 = vpop.permute.xlu0 %585 }
 0x4d7   :  { %v3105_v51 = vadd.f32 %v586_v50, %v578_v48 }
 0x4d8   :  { %v559_v53 = vpop.permute.xlu1 %558 }
 0x4d9   :  { %2672 = vtanh.f32 %v3105_v51  ;;  %v3108_v54 = vadd.f32 %v559_v53, %v551_v52  ;;  %v790_v31 = vrot.slane %v3105_v51, 2 }
 0x4db   :  { %2674 = vtanh.f32 %v3108_v54  ;;  %v763_v33 = vrot.slane %v3108_v54, 6 }
 0x4e3   :  { %v2673_v55 = vpop.eup %2672 }
 0x4e4   :  { %591 = vrot.lane.b32.xlu0 %v2673_v55, %s2878_s4 }
 0x4e5   :  { %v2675_v56 = vpop.eup %2674 }
 0x4e6   :  { %564 = vrot.lane.b32.xlu1 %v2675_v56, %s2878_s4 }
 0x556   :  { %v592_v57 = vpop.permute.xlu0 %591 }
 0x557   :  { %v3113_v58 = vmul.f32 %v2669_v38, %v592_v57 }
 0x558   :  { %v565_v60 = vpop.permute.xlu1 %564 }
 0x559   :  { %v676_v59 = vrot.slane %v3113_v58, 4  ;;  %v3116_v61 = vmul.f32 %v2671_v42, %v565_v60 }
 0x55b   :  { %677 = vrot.lane.b32.xlu0 %v676_v59, %s2879_s13  ;;  %v596_v62 = vrot.slane %v3116_v61, 2 }
 0x55d   :  { %597 = vrot.lane.b32.xlu1 %v596_v62, %s2879_s13 }
 0x5cd   :  { %v678_v63 = vpop.permute.xlu0 %677 }
 0x5ce   :  { %2369 = vmatmul.mubr.msk.f32.vlgmr.msra.gmra.mrb[8].mxu0 %vm102_vm1, %v678_v63 }
 0x5cf   :  { %2552 = vmatpush3.bf16.msra.mxu0 %v3020_v23  ;;  %2390 = vmatprep.mubr.msk.f32.mxu0 %vm2877_vm0, %v2876_v1  ;;  %v598_v2 = vpop.permute.xlu1 %597 }
 0x5d0   :  { %2553 = vmatprep.subr.bf16.mxu0 %v2875_v0  ;;  %2358 = vmatmul.mubr.msk.f32.vlgmr.msra.gmra.mrb[4].mxu1 %vm102_vm1, %v598_v2 }
 0x5d1   :  { %2546 = vmatpush3.bf16.msra.mxu1 %v3011_v14  ;;  %2379 = vmatprep.mubr.msk.f32.mxu1 %vm2877_vm0, %v2876_v1 }
 0x5d2   :  { %2547 = vmatprep.subr.bf16.mxu1 %v2875_v0 }
 0x5d3   :  { %2555 = vmatpush3.bf16.msra.mxu0 %v3028_v27 }
 0x5d4   :  { %2562 = vmatprep.subr.bf16.mxu0 %v2875_v0 }
 0x5d5   :  { %2549 = vmatpush3.bf16.msra.mxu1 %v3017_v19 }
 0x5d6   :  { %2556 = vmatprep.subr.bf16.mxu1 %v2875_v0 }
 0x6a1   :  { %v747_v3 = vpop.f32.mrb[8].mxu0 }
 0x6a2   :  { %v752_v4 = vrot.slane %v747_v3, 6  ;;  %v2370_v5 = vpop.f32.mrb[9].mxu0 }
 0x6a3   :  { %v667_v7 = vpop.f32.mrb[4].mxu1 }
 0x6a4   :  { %v754_v6 = vadd.f32 %v752_v4, %v3059_v45  ;;  %v672_v8 = vrot.slane %v667_v7, 4  ;;  %v2359_v9 = vpop.f32.mrb[5].mxu1 }
 0x6a6   :  { %2676 = vtanh.f32 %v754_v6  ;;  %v674_v10 = vadd.f32 %v672_v8, %v3057_v44  ;;  %v2192_v15 = vmul.f32 -1.442695, %v754_v6 }
 0x6a8   :  { %2678 = vtanh.f32 %v674_v10  ;;  %v2191_v16 = vmul.f32 -1.442695, %v674_v10 }
 0x6a9   :  { %2680 = vpow2.f32 %v2192_v15 }
 0x6aa   :  { %2682 = vpow2.f32 %v2191_v16 }
 0x6b0   :  { %v2677_v12 = vpop.eup %2676 }
 0x6b1   :  { %794 = vrot.lane.b32.xlu0 %v2677_v12, %s2878_s4 }
 0x6b2   :  { %v2679_v13 = vpop.eup %2678 }
 0x6b3   :  { %767 = vrot.lane.b32.xlu1 %v2679_v13, %s2878_s4  ;;  %v2681_v18 = vpop.eup %2680 }
 0x6b4   :  { %v2683_v20 = vpop.eup %2682  ;;  %v785_v21 = vadd.f32 1.0, %v2681_v18 }
 0x6b5   :  { %v758_v22 = vadd.f32 1.0, %v2683_v20 }
 0x6b6   :  { %2684 = vrcp.f32 %v785_v21 }
 0x6b7   :  { %2686 = vrcp.f32 %v758_v22 }
 0x6c0   :  { %v2685_v24 = vpop.eup %2684 }
 0x6c1   :  { %v2687_v28 = vpop.eup %2686  ;;  %v792_v32 = vmul.f32 %v2685_v24, %v790_v31 }
 0x6c2   :  { %v765_v37 = vmul.f32 %v2687_v28, %v763_v33 }
 0x723   :  { %v795_v25 = vpop.permute.xlu0 %794 }
 0x724   :  { %v797_v26 = vmul.f32 %v2685_v24, %v795_v25 }
 0x725   :  { %v768_v29 = vpop.permute.xlu1 %767 }
 0x726   :  { %799 = vrot.lane.b32.xlu0 %v797_v26, %s2879_s13  ;;  %v770_v30 = vmul.f32 %v2687_v28, %v768_v29 }
 0x728   :  { %772 = vrot.lane.b32.xlu1 %v770_v30, %s2879_s13 }
 0x798   :  { %v800_v34 = vpop.permute.xlu0 %799 }
 0x799   :  { %v3143_v35 = vadd.f32 %v800_v34, %v792_v32 }
 0x79a   :  { %v773_v38 = vpop.permute.xlu1 %772 }
 0x79b   :  { %2688 = vtanh.f32 %v3143_v35  ;;  %v3146_v39 = vadd.f32 %v773_v38, %v765_v37  ;;  %v1001_v13 = vrot.slane %v3143_v35, 2 }
 0x79d   :  { %2690 = vtanh.f32 %v3146_v39  ;;  %v974_v20 = vrot.slane %v3146_v39, 6 }
 0x7a5   :  { %v2689_v40 = vpop.eup %2688 }
 0x7a6   :  { %805 = vrot.lane.b32.xlu0 %v2689_v40, %s2878_s4 }
 0x7a7   :  { %v2691_v42 = vpop.eup %2690 }
 0x7a8   :  { %778 = vrot.lane.b32.xlu1 %v2691_v42, %s2878_s4 }
 0x818   :  { %v806_v43 = vpop.permute.xlu0 %805 }
 0x819   :  { %v3151_v46 = vmul.f32 %v2685_v24, %v806_v43 }
 0x81a   :  { %v779_v48 = vpop.permute.xlu1 %778 }
 0x81b   :  { %v890_v47 = vrot.slane %v3151_v46, 2  ;;  %v3154_v49 = vmul.f32 %v2687_v28, %v779_v48 }
 0x81d   :  { %891 = vrot.lane.b32.xlu0 %v890_v47, %s2879_s13  ;;  %v810_v50 = vrot.slane %v3154_v49, 4 }
 0x81f   :  { %811 = vrot.lane.b32.xlu1 %v810_v50, %s2879_s13 }
 0x88f   :  { %v892_v51 = vpop.permute.xlu0 %891 }
 0x890   :  { %2391 = vmatmul.mubr.msk.f32.vlgmr.msra.gmra.mrb[10].mxu0 %vm102_vm1, %v892_v51 }
 0x891   :  { %2564 = vmatpush3.bf16.msra.mxu0 %v3020_v23  ;;  %2412 = vmatprep.mubr.msk.f32.mxu0 %vm2877_vm0, %v2876_v1  ;;  %v812_v52 = vpop.permute.xlu1 %811 }
 0x892   :  { %2565 = vmatprep.subr.bf16.mxu0 %v2875_v0  ;;  %2380 = vmatmul.mubr.msk.f32.vlgmr.msra.gmra.mrb[6].mxu1 %vm102_vm1, %v812_v52 }
 0x893   :  { %2558 = vmatpush3.bf16.msra.mxu1 %v3011_v14  ;;  %2401 = vmatprep.mubr.msk.f32.mxu1 %vm2877_vm0, %v2876_v1 }
 0x894   :  { %2559 = vmatprep.subr.bf16.mxu1 %v2875_v0 }
 0x895   :  { %2567 = vmatpush3.bf16.msra.mxu0 %v3028_v27 }
 0x896   :  { %2574 = vmatprep.subr.bf16.mxu0 %v2875_v0 }
 0x897   :  { %2561 = vmatpush3.bf16.msra.mxu1 %v3017_v19 }
 0x898   :  { %2568 = vmatprep.subr.bf16.mxu1 %v2875_v0 }
 0x963   :  { %v961_v53 = vpop.f32.mrb[10].mxu0 }
 0x964   :  { %v965_v54 = vadd.f32 %v961_v53, %v3059_v45  ;;  %v2392_v55 = vpop.f32.mrb[11].mxu0 }
 0x965   :  { %v881_v56 = vpop.f32.mrb[6].mxu1 }
 0x966   :  { %2692 = vtanh.f32 %v965_v54  ;;  %v886_v57 = vrot.slane %v881_v56, 2  ;;  %v2381_v59 = vpop.f32.mrb[7].mxu1  ;;  %v2196_v2 = vmul.f32 -1.442695, %v965_v54 }
 0x968   :  { %v888_v60 = vadd.f32 %v886_v57, %v3057_v44 }
 0x96a   :  { %2694 = vtanh.f32 %v888_v60  ;;  %v2195_v3 = vmul.f32 -1.442695, %v888_v60 }
 0x96b   :  { %2696 = vpow2.f32 %v2196_v2 }
 0x96c   :  { %2698 = vpow2.f32 %v2195_v3 }
 0x970   :  { %v2693_v62 = vpop.eup %2692 }
 0x971   :  { %1005 = vrot.lane.b32.xlu0 %v2693_v62, %s2878_s4 }
 0x974   :  { %v2695_v63 = vpop.eup %2694 }
 0x975   :  { %978 = vrot.lane.b32.xlu1 %v2695_v63, %s2878_s4  ;;  %v2697_v4 = vpop.eup %2696 }
 0x976   :  { %v996_v45 = vadd.f32 1.0, %v2697_v4  ;;  %v2699_v5 = vpop.eup %2698 }
 0x977   :  { %v969_v6 = vadd.f32 1.0, %v2699_v5 }
 0x978   :  { %2700 = vrcp.f32 %v996_v45 }
 0x979   :  { %2702 = vrcp.f32 %v969_v6 }
 0x982   :  { %v2701_v7 = vpop.eup %2700 }
 0x983   :  { %v2703_v9 = vpop.eup %2702  ;;  %v1003_v15 = vmul.f32 %v2701_v7, %v1001_v13 }
 0x984   :  { %v976_v21 = vmul.f32 %v2703_v9, %v974_v20 }
 0x9e3   :  { %v1006_v8 = vpop.permute.xlu0 %1005 }
 0x9e4   :  { %v1008_v44 = vmul.f32 %v2701_v7, %v1006_v8 }
 0x9e6   :  { %1010 = vrot.lane.b32.xlu0 %v1008_v44, %s2879_s13 }
 0x9e7   :  { %v979_v10 = vpop.permute.xlu1 %978 }
 0x9e8   :  { %v981_v12 = vmul.f32 %v2703_v9, %v979_v10 }
 0x9ea   :  { %983 = vrot.lane.b32.xlu1 %v981_v12, %s2879_s13 }
 0xa58   :  { %v1011_v16 = vpop.permute.xlu0 %1010 }
 0xa59   :  { %v3180_v18 = vadd.f32 %v1011_v16, %v1003_v15 }
 0xa5b   :  { %2704 = vtanh.f32 %v3180_v18  ;;  %v1211_v2 = vrot.slane %v3180_v18, 2 }
 0xa5c   :  { %v984_v22 = vpop.permute.xlu1 %983 }
 0xa5d   :  { %v3184_v24 = vadd.f32 %v984_v22, %v976_v21 }
 0xa5f   :  { %2706 = vtanh.f32 %v3184_v24  ;;  %v1184_v5 = vrot.slane %v3184_v24, 6 }
 0xa65   :  { %v2705_v25 = vpop.eup %2704 }
 0xa66   :  { %1016 = vrot.lane.b32.xlu0 %v2705_v25, %s2878_s4 }
 0xa69   :  { %v2707_v26 = vpop.eup %2706 }
 0xa6a   :  { %989 = vrot.lane.b32.xlu1 %v2707_v26, %s2878_s4 }
 0xad8   :  { %v1017_v28 = vpop.permute.xlu0 %1016 }
 0xad9   :  { %v3189_v29 = vmul.f32 %v2701_v7, %v1017_v28 }
 0xadb   :  { %1098 = vrot.lane.b32.xlu0 %v3189_v29, %s2879_s13 }
 0xadc   :  { %v990_v30 = vpop.permute.xlu1 %989 }
 0xadd   :  { %v3193_v31 = vmul.f32 %v2703_v9, %v990_v30 }
 0xadf   :  { %v1021_v32 = vrot.slane %v3193_v31, 6 }
 0xae1   :  { %1022 = vrot.lane.b32.xlu1 %v1021_v32, %s2879_s13 }
 0xb4d   :  { %v1099_v33 = vpop.permute.xlu0 %1098 }
 0xb4e   :  { %2413 = vmatmul.mubr.msk.f32.vlgmr.msra.gmra.mrb[12].mxu0 %vm102_vm1, %v1099_v33 }
 0xb4f   :  { %2576 = vmatpush3.bf16.msra.mxu0 %v3020_v23  ;;  %2434 = vmatprep.mubr.msk.f32.mxu0 %vm2877_vm0, %v2876_v1 }
 0xb50   :  { %2577 = vmatprep.subr.bf16.mxu0 %v2875_v0 }
 0xb53   :  { %2579 = vmatpush3.bf16.msra.mxu0 %v3028_v27  ;;  %v1023_v34 = vpop.permute.xlu1 %1022 }
 0xb54   :  { %2586 = vmatprep.subr.bf16.mxu0 %v2875_v0  ;;  %2402 = vmatmul.mubr.msk.f32.vlgmr.msra.gmra.mrb[8].mxu1 %vm102_vm1, %v1023_v34 }
 0xb55   :  { %2570 = vmatpush3.bf16.msra.mxu1 %v3011_v14  ;;  %2423 = vmatprep.mubr.msk.f32.mxu1 %vm2877_vm0, %v2876_v1 }
 0xb56   :  { %2571 = vmatprep.subr.bf16.mxu1 %v2875_v0 }
 0xb59   :  { %2573 = vmatpush3.bf16.msra.mxu1 %v3017_v19 }
 0xb5a   :  { %2580 = vmatprep.subr.bf16.mxu1 %v2875_v0 }
 0xc21   :  { %v1168_v35 = vpop.f32.mrb[12].mxu0 }
 0xc22   :  { %v1173_v37 = vrot.slane %v1168_v35, 2  ;;  %v2414_v38 = vpop.f32.mrb[13].mxu0 }
 0xc24   :  { %v1175_v39 = vadd.f32 %v1173_v37, %v3053_v36 }
 0xc26   :  { %2708 = vtanh.f32 %v1175_v39  ;;  %v2200_v50 = vmul.f32 -1.442695, %v1175_v39 }
 0xc27   :  { %v1092_v40 = vpop.f32.mrb[8].mxu1 }
 0xc28   :  { %v1096_v42 = vadd.f32 %v1092_v40, %v3055_v41  ;;  %v2403_v43 = vpop.f32.mrb[9].mxu1 }
 0xc2a   :  { %2710 = vtanh.f32 %v1096_v42  ;;  %v2199_v51 = vmul.f32 -1.442695, %v1096_v42 }
 0xc2b   :  { %2712 = vpow2.f32 %v2200_v50 }
 0xc2c   :  { %2714 = vpow2.f32 %v2199_v51 }
 0xc30   :  { %v2709_v47 = vpop.eup %2708 }
 0xc31   :  { %1215 = vrot.lane.b32.xlu0 %v2709_v47, %s2878_s4 }
 0xc34   :  { %v2711_v48 = vpop.eup %2710 }
 0xc35   :  { %1188 = vrot.lane.b32.xlu1 %v2711_v48, %s2878_s4  ;;  %v2713_v52 = vpop.eup %2712 }
 0xc36   :  { %v1206_v53 = vadd.f32 1.0, %v2713_v52  ;;  %v2715_v54 = vpop.eup %2714 }
 0xc37   :  { %v1179_v55 = vadd.f32 1.0, %v2715_v54 }
 0xc38   :  { %2716 = vrcp.f32 %v1206_v53 }
 0xc39   :  { %2718 = vrcp.f32 %v1179_v55 }
 0xc42   :  { %v2717_v56 = vpop.eup %2716 }
 0xc43   :  { %v2719_v60 = vpop.eup %2718  ;;  %v1213_v3 = vmul.f32 %v2717_v56, %v1211_v2 }
 0xc44   :  { %v1186_v6 = vmul.f32 %v2719_v60, %v1184_v5 }
 0xca3   :  { %v1216_v57 = vpop.permute.xlu0 %1215 }
 0xca4   :  { %v1218_v59 = vmul.f32 %v2717_v56, %v1216_v57 }
 0xca6   :  { %1220 = vrot.lane.b32.xlu0 %v1218_v59, %s2879_s13 }
 0xca7   :  { %v1189_v62 = vpop.permute.xlu1 %1188 }
 0xca8   :  { %v1191_v63 = vmul.f32 %v2719_v60, %v1189_v62 }
 0xcaa   :  { %1193 = vrot.lane.b32.xlu1 %v1191_v63, %s2879_s13 }
 0xd18   :  { %v1221_v4 = vpop.permute.xlu0 %1220 }
 0xd19   :  { %v3218_v45 = vadd.f32 %v1221_v4, %v1213_v3 }
 0xd1b   :  { %2720 = vtanh.f32 %v3218_v45  ;;  %v1424_v53 = vrot.slane %v3218_v45, 2 }
 0xd1c   :  { %v1194_v7 = vpop.permute.xlu1 %1193 }
 0xd1d   :  { %v3222_v8 = vadd.f32 %v1194_v7, %v1186_v6 }
 0xd1f   :  { %2722 = vtanh.f32 %v3222_v8  ;;  %v1397_v55 = vrot.slane %v3222_v8, 6 }
 0xd25   :  { %v2721_v44 = vpop.eup %2720 }
 0xd26   :  { %1226 = vrot.lane.b32.xlu0 %v2721_v44, %s2878_s4 }
 0xd29   :  { %v2723_v9 = vpop.eup %2722 }
 0xd2a   :  { %1199 = vrot.lane.b32.xlu1 %v2723_v9, %s2878_s4 }
 0xd98   :  { %v1227_v10 = vpop.permute.xlu0 %1226 }
 0xd99   :  { %v3227_v12 = vmul.f32 %v2717_v56, %v1227_v10 }
 0xd9b   :  { %v1310_v13 = vrot.slane %v3227_v12, 6 }
 0xd9c   :  { %v1200_v15 = vpop.permute.xlu1 %1199 }
 0xd9d   :  { %1311 = vrot.lane.b32.xlu0 %v1310_v13, %s2879_s13  ;;  %v1202_v16 = vmul.f32 %v2719_v60, %v1200_v15 }
 0xd9f   :  { %1231 = vrot.lane.b32.xlu1 %v1202_v16, %s2879_s13 }
 0xe0f   :  { %v1312_v18 = vpop.permute.xlu0 %1311 }
 0xe10   :  { %2435 = vmatmul.mubr.msk.f32.vlgmr.msra.gmra.mrb[14].mxu0 %vm102_vm1, %v1312_v18 }
 0xe11   :  { %2588 = vmatpush3.bf16.msra.mxu0 %v3020_v23  ;;  %2456 = vmatprep.mubr.msk.f32.mxu0 %vm2877_vm0, %v2876_v1  ;;  %v3236_v20 = vpop.permute.xlu1 %1231 }
 0xe12   :  { %2589 = vmatprep.subr.bf16.mxu0 %v2875_v0  ;;  %2424 = vmatmul.mubr.msk.f32.vlgmr.msra.gmra.mrb[10].mxu1 %vm102_vm1, %v3236_v20 }
 0xe13   :  { %2582 = vmatpush3.bf16.msra.mxu1 %v3011_v14  ;;  %2445 = vmatprep.mubr.msk.f32.mxu1 %vm2877_vm0, %v2876_v1 }
 0xe14   :  { %2583 = vmatprep.subr.bf16.mxu1 %v2875_v0 }
 0xe15   :  { %2591 = vmatpush3.bf16.msra.mxu0 %v3028_v27 }
 0xe16   :  { %2598 = vmatprep.subr.bf16.mxu0 %v2875_v0 }
 0xe17   :  { %2585 = vmatpush3.bf16.msra.mxu1 %v3017_v19 }
 0xe18   :  { %2592 = vmatprep.subr.bf16.mxu1 %v2875_v0 }
 0xee3   :  { %v1381_v21 = vpop.f32.mrb[14].mxu0 }
 0xee4   :  { %v1386_v22 = vrot.slane %v1381_v21, 4  ;;  %v2436_v24 = vpop.f32.mrb[15].mxu0 }
 0xee5   :  { %v1301_v26 = vpop.f32.mrb[10].mxu1 }
 0xee6   :  { %v1388_v25 = vadd.f32 %v1386_v22, %v3053_v36  ;;  %v1306_v28 = vrot.slane %v1301_v26, 6  ;;  %v2425_v30 = vpop.f32.mrb[11].mxu1 }
 0xee8   :  { %2724 = vtanh.f32 %v1388_v25  ;;  %v1308_v32 = vadd.f32 %v1306_v28, %v3055_v41  ;;  %v2204_v35 = vmul.f32 -1.442695, %v1388_v25 }
 0xeea   :  { %2726 = vtanh.f32 %v1308_v32  ;;  %v2203_v37 = vmul.f32 -1.442695, %v1308_v32 }
 0xeeb   :  { %2728 = vpow2.f32 %v2204_v35 }
 0xeec   :  { %2730 = vpow2.f32 %v2203_v37 }
 0xef2   :  { %v2725_v33 = vpop.eup %2724 }
 0xef3   :  { %1428 = vrot.lane.b32.xlu0 %v2725_v33, %s2878_s4 }
 0xef4   :  { %v2727_v34 = vpop.eup %2726 }
 0xef5   :  { %1401 = vrot.lane.b32.xlu1 %v2727_v34, %s2878_s4  ;;  %v2729_v38 = vpop.eup %2728 }
 0xef6   :  { %v2731_v39 = vpop.eup %2730  ;;  %v1419_v40 = vadd.f32 1.0, %v2729_v38 }
 0xef7   :  { %v1392_v42 = vadd.f32 1.0, %v2731_v39 }
 0xef8   :  { %2732 = vrcp.f32 %v1419_v40 }
 0xef9   :  { %2734 = vrcp.f32 %v1392_v42 }
 0xf02   :  { %v2733_v43 = vpop.eup %2732 }
 0xf03   :  { %v2735_v50 = vpop.eup %2734  ;;  %v1426_v54 = vmul.f32 %v2733_v43, %v1424_v53 }
 0xf04   :  { %v1399_v59 = vmul.f32 %v2735_v50, %v1397_v55 }
 0xf65   :  { %v1429_v47 = vpop.permute.xlu0 %1428 }
 0xf66   :  { %v1431_v48 = vmul.f32 %v2733_v43, %v1429_v47 }
 0xf67   :  { %v1402_v51 = vpop.permute.xlu1 %1401 }
 0xf68   :  { %1433 = vrot.lane.b32.xlu0 %v1431_v48, %s2879_s13  ;;  %v1404_v52 = vmul.f32 %v2735_v50, %v1402_v51 }
 0xf6a   :  { %1406 = vrot.lane.b32.xlu1 %v1404_v52, %s2879_s13 }
 0xfda   :  { %v1434_v56 = vpop.permute.xlu0 %1433 }
 0xfdb   :  { %v3257_v57 = vadd.f32 %v1434_v56, %v1426_v54 }
 0xfdc   :  { %v1407_v60 = vpop.permute.xlu1 %1406 }
 0xfdd   :  { %2736 = vtanh.f32 %v3257_v57  ;;  %v3260_v62 = vadd.f32 %v1407_v60, %v1399_v59  ;;  %v1638_v38 = vrot.slane %v3257_v57, 2 }
 0xfdf   :  { %2738 = vtanh.f32 %v3260_v62  ;;  %v1611_v40 = vrot.slane %v3260_v62, 6 }
 0xfe7   :  { %v2737_v63 = vpop.eup %2736 }
 0xfe8   :  { %1439 = vrot.lane.b32.xlu0 %v2737_v63, %s2878_s4 }
 0xfe9   :  { %v2739_v2 = vpop.eup %2738 }
 0xfea   :  { %1412 = vrot.lane.b32.xlu1 %v2739_v2, %s2878_s4 }
0x105a   :  { %v1440_v3 = vpop.permute.xlu0 %1439 }
0x105b   :  { %v3265_v4 = vmul.f32 %v2733_v43, %v1440_v3 }
0x105c   :  { %v1413_v5 = vpop.permute.xlu1 %1412 }
0x105d   :  { %v1524_v45 = vrot.slane %v3265_v4, 4  ;;  %v3268_v6 = vmul.f32 %v2735_v50, %v1413_v5 }
0x105f   :  { %1525 = vrot.lane.b32.xlu0 %v1524_v45, %s2879_s13  ;;  %v1444_v7 = vrot.slane %v3268_v6, 2 }
0x1061   :  { %1445 = vrot.lane.b32.xlu1 %v1444_v7, %s2879_s13 }
0x10d1   :  { %v1526_v8 = vpop.permute.xlu0 %1525 }
0x10d2   :  { %2457 = vmatmul.mubr.msk.f32.vlgmr.msra.gmra.mrb[16].mxu0 %vm102_vm1, %v1526_v8 }
0x10d3   :  { %2600 = vmatpush3.bf16.msra.mxu0 %v3020_v23  ;;  %2478 = vmatprep.mubr.msk.f32.mxu0 %vm2877_vm0, %v2876_v1  ;;  %v1446_v44 = vpop.permute.xlu1 %1445 }
0x10d4   :  { %2601 = vmatprep.subr.bf16.mxu0 %v2875_v0  ;;  %2446 = vmatmul.mubr.msk.f32.vlgmr.msra.gmra.mrb[12].mxu1 %vm102_vm1, %v1446_v44 }
0x10d5   :  { %2594 = vmatpush3.bf16.msra.mxu1 %v3011_v14  ;;  %2467 = vmatprep.mubr.msk.f32.mxu1 %vm2877_vm0, %v2876_v1 }
0x10d6   :  { %2595 = vmatprep.subr.bf16.mxu1 %v2875_v0 }
0x10d7   :  { %2603 = vmatpush3.bf16.msra.mxu0 %v3028_v27 }
0x10d9   :  { %2597 = vmatpush3.bf16.msra.mxu1 %v3017_v19 }
0x10da   :  { %2604 = vmatprep.subr.bf16.mxu1 %v2875_v0 }
0x11a5   :  { %v1595_v23 = vpop.f32.mrb[16].mxu0 }
0x11a6   :  { %v1600_v9 = vrot.slane %v1595_v23, 6  ;;  %v2458_v10 = vpop.f32.mrb[17].mxu0 }
0x11a7   :  { %v1515_v15 = vpop.f32.mrb[12].mxu1 }
0x11a8   :  { %v1602_v13 = vadd.f32 %v1600_v9, %v3053_v36  ;;  %v1520_v16 = vrot.slane %v1515_v15, 4  ;;  %v2447_v18 = vpop.f32.mrb[13].mxu1 }
0x11aa   :  { %2740 = vtanh.f32 %v1602_v13  ;;  %v1522_v14 = vadd.f32 %v1520_v16, %v3055_v41  ;;  %v2208_v19 = vmul.f32 -1.442695, %v1602_v13 }
0x11ac   :  { %2742 = vtanh.f32 %v1522_v14  ;;  %v2207_v22 = vmul.f32 -1.442695, %v1522_v14 }
0x11ad   :  { %2744 = vpow2.f32 %v2208_v19 }
0x11ae   :  { %2746 = vpow2.f32 %v2207_v22 }
0x11b4   :  { %v2741_v21 = vpop.eup %2740 }
0x11b5   :  { %1642 = vrot.lane.b32.xlu0 %v2741_v21, %s2878_s4 }
0x11b6   :  { %v2743_v27 = vpop.eup %2742 }
0x11b7   :  { %1615 = vrot.lane.b32.xlu1 %v2743_v27, %s2878_s4  ;;  %v2745_v24 = vpop.eup %2744 }
0x11b8   :  { %v2747_v25 = vpop.eup %2746  ;;  %v1633_v26 = vadd.f32 1.0, %v2745_v24 }
0x11b9   :  { %v1606_v28 = vadd.f32 1.0, %v2747_v25 }
0x11ba   :  { %2748 = vrcp.f32 %v1633_v26 }
0x11bb   :  { %2750 = vrcp.f32 %v1606_v28 }
0x11c4   :  { %v2749_v30 = vpop.eup %2748 }
0x11c5   :  { %v2751_v34 = vpop.eup %2750  ;;  %v1640_v39 = vmul.f32 %v2749_v30, %v1638_v38 }
0x11c6   :  { %v1613_v47 = vmul.f32 %v2751_v34, %v1611_v40 }
0x1227   :  { %v1643_v32 = vpop.permute.xlu0 %1642 }
0x1228   :  { %v1645_v33 = vmul.f32 %v2749_v30, %v1643_v32 }
0x1229   :  { %v1616_v35 = vpop.permute.xlu1 %1615 }
0x122a   :  { %1647 = vrot.lane.b32.xlu0 %v1645_v33, %s2879_s13  ;;  %v1618_v37 = vmul.f32 %v2751_v34, %v1616_v35 }
0x122c   :  { %1620 = vrot.lane.b32.xlu1 %v1618_v37, %s2879_s13 }
0x129c   :  { %v1648_v42 = vpop.permute.xlu0 %1647 }
0x129d   :  { %v1650_v43 = vadd.f32 %v1648_v42, %v1640_v39 }
0x129e   :  { %v1621_v48 = vpop.permute.xlu1 %1620 }
0x129f   :  { %2752 = vtanh.f32 %v1650_v43  ;;  %v1623_v50 = vadd.f32 %v1621_v48, %v1613_v47  ;;  %v1849_v19 = vrot.slane %v1650_v43, 2 }
0x12a1   :  { %2754 = vtanh.f32 %v1623_v50  ;;  %v1822_v26 = vrot.slane %v1623_v50, 6 }
0x12a9   :  { %v2753_v51 = vpop.eup %2752 }
0x12aa   :  { %1653 = vrot.lane.b32.xlu0 %v2753_v51, %s2878_s4 }
0x12ab   :  { %v2755_v52 = vpop.eup %2754 }
0x12ac   :  { %1626 = vrot.lane.b32.xlu1 %v2755_v52, %s2878_s4 }
0x131c   :  { %v1654_v53 = vpop.permute.xlu0 %1653 }
0x131d   :  { %v1656_v54 = vmul.f32 %v2749_v30, %v1654_v53 }
0x131e   :  { %v1627_v56 = vpop.permute.xlu1 %1626 }
0x131f   :  { %v1738_v55 = vrot.slane %v1656_v54, 2  ;;  %v1629_v57 = vmul.f32 %v2751_v34, %v1627_v56 }
0x1321   :  { %1739 = vrot.lane.b32.xlu0 %v1738_v55, %s2879_s13  ;;  %v1658_v59 = vrot.slane %v1629_v57, 4 }
0x1323   :  { %1659 = vrot.lane.b32.xlu1 %v1658_v59, %s2879_s13 }
0x1393   :  { %v1740_v60 = vpop.permute.xlu0 %1739 }
0x1394   :  { %2479 = vmatmul.mubr.msk.f32.vlgmr.msra.gmra.mrb[18].mxu0 %vm102_vm1, %v1740_v60 }
0x1395   :  { %v1660_v62 = vpop.permute.xlu1 %1659 }
0x1396   :  { %2468 = vmatmul.mubr.msk.f32.vlgmr.msra.gmra.mrb[14].mxu1 %vm102_vm1, %v1660_v62 }
0x1397   :  { %2497 = vmatprep.mubr.msk.f32.mxu1 %vm2877_vm0, %v2876_v1 }
0x1467   :  { %v1809_v63 = vpop.f32.mrb[18].mxu0 }
0x1468   :  { %v1813_v2 = vadd.f32 %v1809_v63, %v3053_v36  ;;  %v2480_v3 = vpop.f32.mrb[19].mxu0 }
0x1469   :  { %v1729_v45 = vpop.f32.mrb[14].mxu1 }
0x146a   :  { %2756 = vtanh.f32 %v1813_v2  ;;  %v1734_v5 = vrot.slane %v1729_v45, 2  ;;  %v2469_v7 = vpop.f32.mrb[15].mxu1  ;;  %v2212_v9 = vmul.f32 -1.442695, %v1813_v2 }
0x146c   :  { %v1736_v8 = vadd.f32 %v1734_v5, %v3055_v41 }
0x146e   :  { %2758 = vtanh.f32 %v1736_v8  ;;  %v2211_v1 = vmul.f32 -1.442695, %v1736_v8 }
0x146f   :  { %2760 = vpow2.f32 %v2212_v9 }
0x1470   :  { %2762 = vpow2.f32 %v2211_v1 }
0x1474   :  { %v2757_v44 = vpop.eup %2756 }
0x1475   :  { %1853 = vrot.lane.b32.xlu0 %v2757_v44, %s2878_s4 }
0x1478   :  { %v2759_v23 = vpop.eup %2758 }
0x1479   :  { %1826 = vrot.lane.b32.xlu1 %v2759_v23, %s2878_s4  ;;  %v2761_v10 = vpop.eup %2760 }
0x147a   :  { %v1844_v36 = vadd.f32 1.0, %v2761_v10  ;;  %v2763_v13 = vpop.eup %2762 }
0x147b   :  { %v1817_v15 = vadd.f32 1.0, %v2763_v13 }
0x147c   :  { %2764 = vrcp.f32 %v1844_v36 }
0x147d   :  { %2766 = vrcp.f32 %v1817_v15 }
0x1486   :  { %v2765_v16 = vpop.eup %2764 }
0x1487   :  { %v2767_v14 = vpop.eup %2766  ;;  %v1851_v22 = vmul.f32 %v2765_v16, %v1849_v19 }
0x1488   :  { %v1824_v28 = vmul.f32 %v2767_v14, %v1822_v26 }
0x14e7   :  { %v1854_v18 = vpop.permute.xlu0 %1853 }
0x14e8   :  { %v1856_v41 = vmul.f32 %v2765_v16, %v1854_v18 }
0x14ea   :  { %1858 = vrot.lane.b32.xlu0 %v1856_v41, %s2879_s13 }
0x14eb   :  { %v1827_v21 = vpop.permute.xlu1 %1826 }
0x14ec   :  { %v1829_v27 = vmul.f32 %v2767_v14, %v1827_v21 }
0x14ee   :  { %1831 = vrot.lane.b32.xlu1 %v1829_v27, %s2879_s13 }
0x155c   :  { %v1859_v24 = vpop.permute.xlu0 %1858 }
0x155d   :  { %v1861_v25 = vadd.f32 %v1859_v24, %v1851_v22 }
0x155f   :  { %2768 = vtanh.f32 %v1861_v25 }
0x1560   :  { %v1832_v30 = vpop.permute.xlu1 %1831 }
0x1561   :  { %v1834_v32 = vadd.f32 %v1832_v30, %v1824_v28 }
0x1563   :  { %2770 = vtanh.f32 %v1834_v32 }
0x1569   :  { %v2769_v33 = vpop.eup %2768 }
0x156a   :  { %1864 = vrot.lane.b32.xlu0 %v2769_v33, %s2878_s4 }
0x156d   :  { %v2771_v34 = vpop.eup %2770 }
0x156e   :  { %1874 = vrot.lane.b32.xlu0 %v3116_v61, %s2879_s13  ;;  %1837 = vrot.lane.b32.xlu1 %v2771_v34, %s2878_s4 }
0x1572   :  { %1881 = vrot.lane.b32.xlu0 %v3154_v49, %s2879_s13  ;;  %1877 = vrot.lane.b32.xlu1 %v1656_v54, %s2878_s4 }
0x1576   :  { %1891 = vrot.lane.b32.xlu0 %v3227_v12, %s2878_s4  ;;  %1884 = vrot.lane.b32.xlu1 %v3265_v4, %s2878_s4 }
0x157a   :  { %1903 = vrot.lane.b32.xlu0 %v3151_v46, %s2878_s4  ;;  %1888 = vrot.lane.b32.xlu1 %v3193_v31, %s2879_s13 }
0x157e   :  { %1907 = vrot.lane.b32.xlu0 %v1629_v57, %s2879_s13  ;;  %1900 = vrot.lane.b32.xlu1 %v3268_v6, %s2879_s13 }
0x1582   :  { %1896 = vrot.lane.b32.xlu1 %v3189_v29, %s2878_s4 }
0x1586   :  { %1910 = vrot.lane.b32.xlu1 %v3113_v58, %s2878_s4  ;;  %v2213_v58 = vld [vmem:[%s3430_s5] ss:$0 sm:$0xff] }
0x158a   :  { %1918 = vrot.lane.b32.xlu1 %v3075_v11, %s2878_s4 }
0x15dc   :  { %v1865_v61 = vpop.permute.xlu0 %1864 }
0x15dd   :  { %v1867_v49 = vmul.f32 %v2765_v16, %v1865_v61 }
0x15df   :  { %1870 = vrot.lane.b32.xlu0 %v1867_v49, %s2878_s4 }
0x15e0   :  { %v1875_v46 = vpop.permute.xlu0 %1874  ;;  %v1838_v31 = vpop.permute.xlu1 %1837 }
0x15e1   :  { %v1840_v12 = vmul.f32 %v2767_v14, %v1838_v31 }
0x15e3   :  { %1915 = vrot.lane.b32.xlu0 %v1840_v12, %s2879_s13 }
0x15e4   :  { %v1882_v4 = vpop.permute.xlu0 %1881  ;;  %v1878_v6 = vpop.permute.xlu1 %1877 }
0x15e5   :  { %v3350_v54 = vsel %vm102_vm1, %v1875_v46, %v1878_v6 }
0x15e6   :  { %v1933_v57 = vmul.f32 %v2213_v58, %v3350_v54 }
0x15e8   :  { %v1885_v35 = vpop.permute.xlu1 %1884  ;;  %v1892_v11 = vpop.permute.xlu0 %1891  ;;  %v1935_v60 = vsel %vm1934_vm3, %v1933_v57, 0.0  ;;  %v2077_v57 = vld [vmem:[%s3431_s6 + $0x18] sm:$0xff] }
0x15e9   :  { %v3335_v29 = vsel %vm102_vm1, %v1882_v4, %v1885_v35  ;;  %v2880_v35 = vmov 1  }
0x15ea   :  { %v1938_v37 = vmul.f32 %v2213_v58, %v3335_v29  ;;  %2636 = vset.pattern.permute.xlu0 %v2880_v35 }
0x15ec   :  { %v1889_v38 = vpop.permute.xlu1 %1888  ;;  %v1940_v39 = vsel %vm1939_vm2, %v1938_v37, 0.0  ;;  %v1904_v40 = vpop.permute.xlu0 %1903 }
0x15ed   :  { %1941 = vadd.xlane.f32.xlu1 %v1940_v39  ;;  %v3356_v59 = vsel %vm102_vm1, %v1889_v38, %v1892_v11  ;;  %v2882_v39 = vmov 2  }
0x15ee   :  { %v1943_v62 = vmul.f32 %v2213_v58, %v3356_v59 }
0x15f0   :  { %v1901_v42 = vpop.permute.xlu1 %1900  ;;  %v1908_v51 = vpop.permute.xlu0 %1907  ;;  %v1945_v2 = vsel %vm1944_vm4, %v1943_v62, 0.0  ;;  %v2078_v62 = vld [vmem:[%s3431_s6 + $0x20] sm:$0xff] }
0x15f1   :  { %v3343_v43 = vsel %vm102_vm1, %v1901_v42, %v1904_v40  ;;  %v2883_v40 = vmov 7   ;;  %v2884_v42 = vmov 3  }
0x15f2   :  { %v1952_v47 = vmul.f32 %v2213_v58, %v3343_v43 }
0x15f4   :  { %v1897_v48 = vpop.permute.xlu1 %1896  ;;  %v1953_v50 = vsel %vm1934_vm3, %v1952_v47, 0.0  ;;  %v2885_v47 = vmov 4  }
0x15f5   :  { %1954 = vadd.xlane.f32.xlu1 %v1953_v50  ;;  %v3361_v63 = vsel %vm102_vm1, %v3236_v20, %v1897_v48  ;;  %v2886_v48 = vmov 5   ;;  %v2074_v50 = vld [vmem:[%s3431_s6] sm:$0xff] }
0x15f6   :  { %v1948_v3 = vmul.f32 %v2213_v58, %v3361_v63 }
0x15f8   :  { %v1911_v52 = vpop.permute.xlu1 %1910  ;;  %v1949_v45 = vsel %vm1929_vm5, %v1948_v3, 0.0 }
0x15f9   :  { %v3347_v53 = vsel %vm102_vm1, %v1908_v51, %v1911_v52  ;;  %v2075_v51 = vld [vmem:[%s3431_s6 + $0x8] sm:$0xff] }
0x15fa   :  { %v1956_v55 = vmul.f32 %v2213_v58, %v3347_v53  ;;  %v2605_v52 = vpack.c.bf16 %v2075_v51, %v2074_v50 }
0x15fc   :  { %v1957_v56 = vsel %vm1939_vm2, %v1956_v55, 0.0  ;;  %v1919_v20 = vpop.permute.xlu1 %1918  ;;  %2606 = vmatpush3.bf16.msra.mxu1 %v2605_v52  ;;  %v2887_v55 = vmov 6  }
0x15fd   :  { %1958 = vadd.xlane.f32.xlu1 %v1957_v56  ;;  %2607 = vmatprep.subr.bf16.mxu1 %v2875_v0  ;;  %v2076_v56 = vld [vmem:[%s3431_s6 + $0x10] sm:$0xff] }
0x1602   :  { %1936 = vadd.xlane.f32.xlu0 %v1935_v60  ;;  %v2608_v60 = vpack.c.bf16 %v2077_v57, %v2076_v56 }
0x1604   :  { %2609 = vmatpush3.bf16.msra.mxu1 %v2608_v60 }
0x1605   :  { %2610 = vmatprep.subr.bf16.mxu1 %v2875_v0 }
0x1606   :  { %1946 = vadd.xlane.f32.xlu0 %v1945_v2  ;;  %v2079_v2 = vld [vmem:[%s3431_s6 + $0x28] sm:$0xff] }
0x1607   :  { %v2611_v3 = vpack.c.bf16 %v2079_v2, %v2078_v62 }
0x1609   :  { %2612 = vmatpush3.bf16.msra.mxu1 %v2611_v3 }
0x160a   :  { %1950 = vadd.xlane.f32.xlu0 %v1949_v45  ;;  %2613 = vmatprep.subr.bf16.mxu1 %v2875_v0  ;;  %v2080_v45 = vld [vmem:[%s3431_s6 + $0x30] sm:$0xff]  ;;  %v2027_v0 = vrot.slane %v3335_v29, 4 }
0x1651   :  { %v1871_v5 = vpop.permute.xlu0 %1870 }
0x1652   :  { %v3367_v7 = vsel %vm102_vm1, %v3081_v17, %v1871_v5  ;;  %v2081_v5 = vld [vmem:[%s3431_s6 + $0x38] sm:$0xff] }
0x1653   :  { %v1928_v8 = vmul.f32 %v2213_v58, %v3367_v7 }
0x1655   :  { %v1930_v44 = vsel %vm1929_vm5, %v1928_v8, 0.0  ;;  %v1916_v23 = vpop.permute.xlu0 %1915  ;;  %v2614_v8 = vpack.c.bf16 %v2081_v5, %v2080_v45 }
0x1656   :  { %1931 = vadd.xlane.f32.xlu0 %v1930_v44  ;;  %v3371_v9 = vsel %vm102_vm1, %v1916_v23, %v1919_v20 }
0x1657   :  { %v1960_v1 = vmul.f32 %v2213_v58, %v3371_v9  ;;  %v2881_v58 = vmov 0   ;;  %2615 = vmatpush3.bf16.msra.mxu1 %v2614_v8 }
0x1658   :  { %2635 = vset.pattern.permute.xlu1 %v2881_v58 }
0x1659   :  { %v1961_v10 = vsel %vm1944_vm4, %v1960_v1, 0.0  ;;  %v2019_v1 = vrot.slane %v3350_v54, 2  ;;  %v2056_v54 = vrot.slane %v3347_v53, 4 }
0x165a   :  { %1962 = vadd.xlane.f32.xlu0 %v1961_v10 }
0x167a   :  { %v1942_v15 = vpop.xlane.xlu1 %1941 }
0x167b   :  { %v1968_v41 = vrot.slane %v1942_v15, 4 }
0x1682   :  { %v1955_v17 = vpop.xlane.xlu1 %1954 }
0x1683   :  { %v1974_v24 = vrot.slane %v1955_v17, 2 }
0x168a   :  { %v1959_v21 = vpop.xlane.xlu1 %1958 }
0x168b   :  { %v1977_v26 = vrot.slane %v1959_v21, 4 }
0x168f   :  { %v1937_v36 = vpop.xlane.xlu0 %1936 }
0x1690   :  { %v1965_v18 = vrot.slane %v1937_v36, 2 }
0x1693   :  { %v1947_v13 = vpop.xlane.xlu0 %1946 }
0x1694   :  { %v1971_v27 = vrot.slane %v1947_v13, 6  ;;  %v2035_v13 = vrot.slane %v3356_v59, 6 }
0x1697   :  { %v1951_v16 = vpop.xlane.xlu0 %1950 }
0x16e3   :  { %v1932_v14 = vpop.xlane.xlu0 %1931 }
0x16e4   :  { %v1983_v19 = vsel %vm1982_vm6, %v1932_v14, %v1965_v18 }
0x16e5   :  { %v1985_v22 = vsel %vm1984_vm7, %v1983_v19, %v1968_v41 }
0x16e6   :  { %v1987_v25 = vsel %vm1986_vm8, %v1985_v22, %v1971_v27  ;;  %v2048_v22 = vrot.slane %v3343_v43, 2  ;;  %v2214_v43 = vld [vmem:[%s3432_s7] ss:$0 sm:$0xff] }
0x16e7   :  { %v1989_v28 = vsel %vm1988_vm9, %v1987_v25, %v1951_v16  ;;  %v1963_v30 = vpop.xlane.xlu0 %1962 }
0x16e8   :  { %v1991_v32 = vsel %vm1990_vm10, %v1989_v28, %v1974_v24  ;;  %v1980_v33 = vrot.slane %v1963_v30, 6 }
0x16e9   :  { %v1993_v34 = vsel %vm1992_vm11, %v1991_v32, %v1977_v26 }
0x16ea   :  { %v1995_v61 = vsel %vm1994_vm12, %v1993_v34, %v1980_v33 }
0x16eb   :  { %v1997_v49 = vsel %vm1996_vm13, %v1995_v61, -inf }
0x16ec   :  { %1998 = vmax.xlane.f32.xlu1 %v1997_v49 }
0x1779   :  { %v1999_v46 = vpop.xlane.xlu1 %1998 }
0x177a   :  { %v2000_v31 = vsub.f32 %v1995_v61, %v1999_v46 }
0x177c   :  { %v2001_v12 = vmul.f32 1.442695, %v2000_v31 }
0x177e   :  { %2772 = vpow2.f32 %v2001_v12 }
0x1788   :  { %v2773_v4 = vpop.eup %2772 }
0x1789   :  { %v2003_v6 = vsel %vm1996_vm13, %v2773_v4, 0.0 }
0x178a   :  { %2004 = vadd.xlane.f32.xlu0 %v2003_v6 }
0x1817   :  { %v2005_v11 = vpop.xlane.xlu0 %2004 }
0x1818   :  { %2774 = vrcp.f32 %v2005_v11 }
0x1822   :  { %v2775_v37 = vpop.eup %2774 }
0x1823   :  { %v2007_v38 = vmul.f32 %v2775_v37, %v2773_v4 }
0x1825   :  { %2015 = vperm.xlu0 %2636, %v2007_v38   ;;  %2010 = vperm.xlu1 %2635, %v2007_v38  }
0x1829   :  { %2637 = vset.pattern.permute.xlu1 %v2882_v39  ;;  %2643 = vset.pattern.permute.xlu0 %v2883_v40 }
0x182a   :  { %2023 = vperm.xlu1 %2637, %v2007_v38  }
0x182e   :  { %2638 = vset.pattern.permute.xlu1 %v2884_v42 }
0x182f   :  { %2031 = vperm.xlu1 %2638, %v2007_v38  }
0x1833   :  { %2639 = vset.pattern.permute.xlu1 %v2885_v47 }
0x1834   :  { %2039 = vperm.xlu1 %2639, %v2007_v38  }
0x1838   :  { %2640 = vset.pattern.permute.xlu1 %v2886_v48 }
0x1839   :  { %2044 = vperm.xlu1 %2640, %v2007_v38  }
0x183d   :  { %2641 = vset.pattern.permute.xlu1 %v2887_v55 }
0x183e   :  { %2052 = vperm.xlu1 %2641, %v2007_v38  }
0x1842   :  { %2642 = vset.pattern.permute.xlu1 %v2883_v40 }
0x1843   :  { %2060 = vperm.xlu1 %2642, %v2007_v38  }
0x18a4   :  { %v2011_v44 = vpop.permute.xlu1 %2010  ;;  %v2016_v23 = vpop.permute.xlu0 %2015 }
0x18a5   :  { %v2021_v10 = vmul.f32 %v2019_v1, %v2016_v23  ;;  %v2013_v36 = vmul.f32 %v2011_v44, %v3367_v7  ;;  %v2064_v7 = vrot.slane %v3371_v9, 6 }
0x18a7   :  { %v2067_v18 = vadd.f32 %v2021_v10, %v2013_v36 }
0x18a9   :  { %v2024_v20 = vpop.permute.xlu1 %2023 }
0x18aa   :  { %v2029_v16 = vmul.f32 %v2027_v0, %v2024_v20 }
0x18ae   :  { %v2032_v15 = vpop.permute.xlu1 %2031 }
0x18af   :  { %v2037_v17 = vmul.f32 %v2035_v13, %v2032_v15 }
0x18b1   :  { %v2068_v41 = vadd.f32 %v2037_v17, %v2029_v16 }
0x18b3   :  { %v2071_v14 = vadd.f32 %v2068_v41, %v2067_v18  ;;  %v2040_v21 = vpop.permute.xlu1 %2039 }
0x18b4   :  { %v2042_v29 = vmul.f32 %v2040_v21, %v3361_v63 }
0x18b8   :  { %v2045_v27 = vpop.permute.xlu1 %2044 }
0x18b9   :  { %v2050_v24 = vmul.f32 %v2048_v22, %v2045_v27 }
0x18bb   :  { %v2069_v28 = vadd.f32 %v2050_v24, %v2042_v29 }
0x18bd   :  { %v2053_v19 = vpop.permute.xlu1 %2052 }
0x18be   :  { %v2058_v59 = vmul.f32 %v2056_v54, %v2053_v19 }
0x18c2   :  { %v2061_v25 = vpop.permute.xlu1 %2060 }
0x18c3   :  { %v2066_v26 = vmul.f32 %v2064_v7, %v2061_v25 }
0x18c5   :  { %v2070_v30 = vadd.f32 %v2066_v26, %v2058_v59 }
0x18c7   :  { %v2072_v32 = vadd.f32 %v2070_v30, %v2069_v28 }
0x18c9   :  { %v2073_v33 = vadd.f32 %v2072_v32, %v2071_v14 }
0x18cb   :  { %2498 = vmatmul.mubr.msk.f32.vlgmr.msra.gmra.mrb[16].mxu1 %vm2089_vm14, %v2073_v33 }
0x199e   :  { %v2159_v53 = vpop.f32.mrb[16].mxu1 }
0x199f   :  { %v2160_v9 = vadd.f32 %v2214_v43, %v2159_v53  ;;  %v2499_v34 = vpop.f32.mrb[17].mxu1 }
0x19a1   :  { %2164 = vst.msk [vmem:[#allocation8] sm:$0x3] %vm2163_vm15, %v2160_v9 }
0x19a2   :  { %2853 = shalt.err (!%p2850_p0)
}
0x19a3   :  { %s2854_s1 = scalar_lea.hbm %s3433_s8, 32 }
0x19a4   :  { %p2855_p1 = scmp.ne.s32.totalorder %s3433_s8, %s2854_s1  ;;  %p2858_p2 = scmp.lt.u32.totalorder %s2854_s1, %s3433_s8 }
0x19a6   :  { %p2860_p3 = pnand %p2858_p2, %p2855_p1 }
0x19a8   :  { %2863 = shalt.err (!%p2860_p3)
}
0x19a9   :  { %2174 = dma.vmem_to_hbm [thread:$0]  %s2172_s28, 32, %s3433_s8, [#allocation4]  }
0x19aa   :  { %2868 = dma.done.wait [#allocation4], 32  }
0x19ab   :  { %2869 = vsyncadd [#allocation4], 4294967264 }
0x19ac   :  { %2178 = vsyncpa [#allocation3], 1 }
0x19ad   :  { %2179 = vsyncpa [#allocation6], 1 }
0x19ae   :  { %2180 = vsyncpa [#allocation4], 1 }

</bundles_post_ra>
